<compile_context>
chip_gen: v5e
topology: v5e:2x2
jax: 0.10.0
libtpu: 0.0.40
codegen_flags: <defaults>
</compile_context>

<pallas_src>
import numpy as np
import jax
import jax.numpy as jnp
from jax import lax
from jax.experimental import pallas as pl
from jax.experimental.pallas import tpu as pltpu

# ----------------------------- hyper-parameters ------------------------------
D_MODEL = 32
D_K = 16
D_V = 16
D_FF = 64
N_HEADS = 2
N_LAYERS = 2
USER_NUMS = 10

TIME_VOCAB = 125       # nn.Embedding(125, 32, padding_idx=124)
TIME_DIM = 32
GRID_VOCAB = 48        # rows of grid_emb
N_TRAJ = 6             # rows of traj_emb (key/value bank)

B = 4                  # number of input trajectories
L = 8                  # sequence length
BL = B * L

GROUP = 2              # sequences flattened per grid step (raise B / tune GROUP
                       # to feed the MXU; keep GL*GL scores within VMEM on v7x)
assert B % GROUP == 0
N_GROUPS = B // GROUP
GL = GROUP * L         # rows per grid step

EXACT_SOFTMAX = False  # True -> exact division in the encoder softmax


# ------------------------------ small helpers --------------------------------
def _layernorm(v, g, b):
    mu = jnp.mean(v, axis=-1, keepdims=True)
    var = jnp.mean(jnp.square(v - mu), axis=-1, keepdims=True)
    return (v - mu) * lax.rsqrt(var + 1e-5) * g + b


def _softmax_rows(scores):
    e = jnp.exp(scores - jnp.max(scores, axis=-1, keepdims=True))
    s = jnp.sum(e, axis=-1, keepdims=True)
    if EXACT_SOFTMAX:
        return e / s
    return e * pl.reciprocal(s, approx=True)


# ------------------------------ fused kernel ----------------------------------
def molnet_kernel(emb_pe_ref, key_bias_ref, query_ref, traj_ref,
                  wqkv_ref, wo_ref, ln_ref, ffn1_ref, ffn2_ref,
                  cls_w1_ref, cls_w2_ref, o_ref):
    f32 = jnp.float32

    # ---- Embedding: tanh(seq_proj + time_proj + b) + positional encoding ----
    x = jnp.tanh(emb_pe_ref[0]) + emb_pe_ref[1]                       # (GL, D)

    # ---- additive attention mask built in-kernel (block-diag + key padding) --
    rid = lax.broadcasted_iota(jnp.int32, (GL, GL), 0)
    cid = lax.broadcasted_iota(jnp.int32, (GL, GL), 1)
    same_seq = None
    for g in range(GROUP):                       # static, GROUP iterations
        lo, hi = g * L, (g + 1) * L
        blk = (rid >= lo) & (rid < hi) & (cid >= lo) & (cid < hi)
        same_seq = blk if same_seq is None else (same_seq | blk)
    neg = jnp.where(same_seq, 0.0, -1e9).astype(f32) + key_bias_ref[0]  # (GL, GL)

    # ---- LocalEncoderNet: N_LAYERS encoder layers, statically unrolled ----
    for layer in range(N_LAYERS):
        ln_l = ln_ref[layer]                                          # (4, 1, D)
        attn = jnp.zeros((GL, D_MODEL), f32)
        for h in range(N_HEADS):                                      # static head unroll
            # per-head weights selected via free leading-axis indices
            qh = jnp.dot(x, wqkv_ref[layer, 0, h], preferred_element_type=f32)  # (GL, dk)
            kh = jnp.dot(x, wqkv_ref[layer, 1, h], preferred_element_type=f32)
            vh = jnp.dot(x, wqkv_ref[layer, 2, h], preferred_element_type=f32)
            # qh @ kh.T without an explicit transpose (1/sqrt(dk) folded into Wq)
            scores = lax.dot_general(qh, kh, (((1,), (1,)), ((), ())),
                                     preferred_element_type=f32) + neg          # (GL, GL)
            p = _softmax_rows(scores)
            ctx = jnp.dot(p, vh, preferred_element_type=f32)                    # (GL, dv)
            # concat-over-heads @ W_O  ==  sum_h ctx_h @ W_O[h]
            attn = attn + jnp.dot(ctx, wo_ref[layer, h], preferred_element_type=f32)

        # residual + LayerNorm 1
        y = _layernorm(attn + x, ln_l[0], ln_l[1])
        # position-wise FFN (conv1d k=1 == Linear), residual + LayerNorm 2
        f1 = ffn1_ref[layer]                                          # (D+1, D_FF)  [W1; b1]
        f2 = ffn2_ref[layer]                                          # (D_FF+1, D)  [W2; b2]
        h1 = jnp.maximum(jnp.dot(y, f1[:D_MODEL], preferred_element_type=f32)
                         + f1[D_MODEL:], 0.0)
        h2 = jnp.dot(h1, f2[:D_FF], preferred_element_type=f32) + f2[D_FF:]
        x = _layernorm(h2 + y, ln_l[2], ln_l[3])

    # ---- mean pool over each sequence's L positions (incl. padded, as torch) ----
    pooled = jnp.mean(x.reshape(GROUP, L, D_MODEL), axis=1)           # (GROUP, D)

    # ---- ElasticAttentionBlock: 'dot' score + 'norm' softmax over traj bank ----
    traj = traj_ref[...]
    score = lax.dot_general(query_ref[0], traj, (((1,), (1,)), ((), ())),
                            preferred_element_type=f32)               # (GROUP, N_TRAJ)
    atten = jax.nn.softmax(score, axis=-1)                            # nn.Softmax(dim=1)
    context = jnp.dot(atten, traj, preferred_element_type=f32)        # (GROUP, D)

    # ---- classifier Linear(2D->D) on cat([pooled, context]) == split weights ----
    c1 = cls_w1_ref[...]                                              # (2D+1, D)
    c2 = cls_w2_ref[...]                                              # (D+1, USER_NUMS)
    hcls = jnp.maximum(
        jnp.dot(pooled, c1[:D_MODEL], preferred_element_type=f32)
        + jnp.dot(context, c1[D_MODEL:2 * D_MODEL], preferred_element_type=f32)
        + c1[2 * D_MODEL:], 0.0)
    logits = jnp.dot(hcls, c2[:D_MODEL], preferred_element_type=f32) + c2[D_MODEL:]
    o_ref[0] = jax.nn.log_softmax(logits, axis=-1)


# ------------------------------- wrapper ---------------------------------------
def _full_spec(arr):
    nd = arr.ndim
    return pl.BlockSpec(arr.shape, lambda g: (0,) * nd)


def _cost_estimate(bytes_accessed):
    mac = lambda m, k, n: 2 * m * k * n
    per_group = 0
    per_group += N_LAYERS * N_HEADS * (3 * mac(GL, D_MODEL, D_K)
                                       + mac(GL, D_K, GL) + mac(GL, GL, D_V)
                                       + mac(GL, D_V, D_MODEL))
    per_group += N_LAYERS * (mac(GL, D_MODEL, D_FF) + mac(GL, D_FF, D_MODEL))
    per_group += mac(GROUP, D_MODEL, N_TRAJ) + mac(GROUP, N_TRAJ, D_MODEL)
    per_group += 2 * mac(GROUP, D_MODEL, D_MODEL) + mac(GROUP, D_MODEL, USER_NUMS)
    trans_per_group = (GL * D_MODEL
                       + N_LAYERS * N_HEADS * GL * GL
                       + N_LAYERS * (N_HEADS + 2) * GL
                       + GROUP * (N_TRAJ + 2 * USER_NUMS))
    return pl.CostEstimate(flops=N_GROUPS * per_group,
                           transcendentals=N_GROUPS * trans_per_group,
                           bytes_accessed=int(bytes_accessed))


def molnet_forward(params, emb_pe, key_bias, query, traj_emb):
    lp, cp = params["layers"], params["clf"]
    operands = (emb_pe, key_bias, query, traj_emb,
                lp["wqkv"], lp["wo"], lp["ln"], lp["ffn1"], lp["ffn2"],
                cp["w1"], cp["w2"])
    in_specs = [
        pl.BlockSpec((2, GL, D_MODEL), lambda g: (0, g, 0)),          # emb_pre + PE planes
        pl.BlockSpec((1, 1, GL), lambda g: (g, 0, 0)),                # per-key pad bias
        pl.BlockSpec((1, GROUP, D_MODEL), lambda g: (g, 0, 0)),       # querry_emb group
    ] + [_full_spec(a) for a in operands[3:]]                         # shared weight slabs
    out_spec = pl.BlockSpec((1, GROUP, USER_NUMS), lambda g: (g, 0, 0))

    nbytes = 4 * (sum(int(a.size) for a in operands) + N_GROUPS * GROUP * USER_NUMS)
    out = pl.pallas_call(
        molnet_kernel,
        out_shape=jax.ShapeDtypeStruct((N_GROUPS, GROUP, USER_NUMS), jnp.float32),
        grid_spec=pltpu.PrefetchScalarGridSpec(
            num_scalar_prefetch=0, grid=(N_GROUPS,),
            in_specs=in_specs, out_specs=out_spec),
        compiler_params=pltpu.CompilerParams(
            dimension_semantics=("parallel",)),                       # groups shard on v7x's 2 TCs
        cost_estimate=_cost_estimate(nbytes),
    )(*operands)
    return out.reshape(B, USER_NUMS)


# ------------------------------- init / glue -----------------------------------
def make_params(key):
    ks = iter(jax.random.split(key, 64))

    def rnd(shape, scale=0.1):
        return scale * jax.random.normal(next(ks), shape, dtype=jnp.float32)

    # sinusoidal positional encoding table (constant), tiled over batch
    pos = np.arange(L, dtype=np.float32)[:, None]
    div = np.exp(np.arange(0, D_MODEL, 2, dtype=np.float32)
                 * (-np.log(10000.0) / D_MODEL))
    pe = np.zeros((L, D_MODEL), np.float32)
    pe[:, 0::2] = np.sin(pos * div)
    pe[:, 1::2] = np.cos(pos * div)
    pe_flat = jnp.asarray(np.tile(pe, (B, 1)))                        # (BL, D)

    inv_sqrt_dk = 1.0 / (float(D_K) ** 0.5)

    def per_head(w, d):       # (D, H*d) -> (H, D, d), head on a leading axis
        return w.reshape(D_MODEL, N_HEADS, d).transpose(1, 0, 2)

    wqkv, wo, ln, ffn1, ffn2 = [], [], [], [], []
    for _ in range(N_LAYERS):
        wq = rnd((D_MODEL, N_HEADS * D_K)) * inv_sqrt_dk              # fold 1/sqrt(dk)
        wk = rnd((D_MODEL, N_HEADS * D_K))
        wv = rnd((D_MODEL, N_HEADS * D_V))
        wqkv.append(jnp.stack([per_head(wq, D_K), per_head(wk, D_K), per_head(wv, D_V)]))
        wo.append(rnd((N_HEADS * D_V, D_MODEL)).reshape(N_HEADS, D_V, D_MODEL))
        ln.append(jnp.stack([jnp.ones((1, D_MODEL), jnp.float32),
                             jnp.zeros((1, D_MODEL), jnp.float32),
                             jnp.ones((1, D_MODEL), jnp.float32),
                             jnp.zeros((1, D_MODEL), jnp.float32)]))
        ffn1.append(jnp.concatenate([rnd((D_MODEL, D_FF)), rnd((1, D_FF))], axis=0))
        ffn2.append(jnp.concatenate([rnd((D_FF, D_MODEL)), rnd((1, D_MODEL))], axis=0))
    layers = {"wqkv": jnp.stack(wqkv),        # (N_LAYERS, 3, H, D, d_k)
              "wo": jnp.stack(wo),            # (N_LAYERS, H, d_v, D)
              "ln": jnp.stack(ln),            # (N_LAYERS, 4, 1, D)
              "ffn1": jnp.stack(ffn1),        # (N_LAYERS, D+1, D_FF)   [W1; b1]
              "ffn2": jnp.stack(ffn2)}        # (N_LAYERS, D_FF+1, D)   [W2; b2]

    clf = {"w1": jnp.concatenate([rnd((D_MODEL, D_MODEL)),            # pooled half
                                  rnd((D_MODEL, D_MODEL)),            # context half
                                  rnd((1, D_MODEL))], axis=0),        # bias row -> (2D+1, D)
           "w2": jnp.concatenate([rnd((D_MODEL, USER_NUMS)),
                                  rnd((1, USER_NUMS))], axis=0)}      # (D+1, USER_NUMS)

    return {"pe": pe_flat,
            "emb_wa": rnd((D_MODEL, D_MODEL)),     # Embedding.fc split on the concat axis
            "emb_wb": rnd((TIME_DIM, D_MODEL)),
            "emb_b": rnd((1, D_MODEL)),
            "layers": layers, "clf": clf}


def prepare_inputs(params, grid_emb, traj_emb, time_table, input_seq, time_seq, input_index):
    """Host-side glue: build-time embedding folds, gathers, per-group packing."""
    # Fold Embedding.fc into the lookup tables (constant-time at build).
    grid_proj = jnp.dot(grid_emb, params["emb_wa"])                   # (GRID_VOCAB, D)
    time_proj = jnp.dot(time_table, params["emb_wb"])                 # (TIME_VOCAB, D); row 124 == 0

    # Exact replica of the PyTorch one-hot double loop (valid entries compacted
    # to the front), expressed as a gather from the pre-projected grid table.
    comp_idx = np.zeros((B, L), np.int32)
    comp_valid = np.zeros((BL, 1), np.float32)
    for b in range(B):
        valid = input_seq[b][input_seq[b] != -1]
        comp_idx[b, :len(valid)] = valid
        comp_valid[b * L:b * L + len(valid), 0] = 1.0
    seq_pre = grid_proj[jnp.asarray(comp_idx.reshape(-1))] * jnp.asarray(comp_valid)
    time_pre = time_proj[jnp.asarray(time_seq.reshape(-1))]           # (BL, D)
    emb_pre = seq_pre + time_pre + params["emb_b"]                    # fc bias folded in
    emb_pe = jnp.stack([emb_pre, params["pe"]], axis=0)               # (2, BL, D)

    # Additive key bias: -1e9 at padded key positions, grouped per grid step.
    key_bias = jnp.asarray(np.where(input_seq == -1, -1e9, 0.0)
                           .astype(np.float32).reshape(N_GROUPS, 1, GL))

    # querry_emb = traj_emb[input_index], grouped
    query = traj_emb[jnp.asarray(input_index)].reshape(N_GROUPS, GROUP, D_MODEL)
    return emb_pe, key_bias, query


if __name__ == "__main__":
    key = jax.random.PRNGKey(0)
    k_par, k_grid, k_traj, k_time = jax.random.split(key, 4)

    params = make_params(k_par)
    grid_emb = 0.1 * jax.random.normal(k_grid, (GRID_VOCAB, D_MODEL), jnp.float32)
    traj_emb = 0.1 * jax.random.normal(k_traj, (N_TRAJ, D_MODEL), jnp.float32)
    time_table = 0.1 * jax.random.normal(k_time, (TIME_VOCAB, TIME_DIM), jnp.float32)
    time_table = time_table.at[124].set(0.0)                          # padding_idx=124

    # input_seq with trailing -1 padding; time_seq uses padding_idx=124 at pads
    input_seq = np.array(
        [[3, 7, 11, 19, 25, 30, -1, -1],
         [1, 2, 40, 41, 42, 43, 44, 45],
         [5, 9, 10, -1, -1, -1, -1, -1],
         [12, 13, 14, 15, 16, 17, 18, -1]], dtype=np.int32)
    time_seq = np.array(
        [[5, 10, 20, 30, 40, 50, 124, 124],
         [1, 3, 5, 7, 9, 11, 13, 15],
         [2, 4, 6, 124, 124, 124, 124, 124],
         [20, 21, 22, 23, 24, 25, 26, 124]], dtype=np.int32)
    state_seq = np.zeros((B, L), np.int32)   # unused by Embedding.forward (kept for parity)
    input_index = np.array([0, 3, 1, 5], dtype=np.int32)

    emb_pe, key_bias, query = prepare_inputs(
        params, grid_emb, traj_emb, time_table, input_seq, time_seq, input_index)

    out = molnet_forward(params, emb_pe, key_bias, query, traj_emb)
    out = jax.block_until_ready(out)
    assert out.shape == (B, USER_NUMS)
    # sanity: rows of log_softmax exponentiate-sum to ~1
    assert np.allclose(np.exp(np.asarray(out)).sum(-1), 1.0, atol=1e-4)
    print("KERNEL_OK")
</pallas_src>

<mosaic_0001>
module attributes {stable_mosaic.version = 11 : i64} {
  func.func @molnet_kernel(%arg0: i32, %arg1: memref<2x16x32xf32, #tpu.memory_space<vmem>>, %arg2: memref<1x1x16xf32, #tpu.memory_space<vmem>>, %arg3: memref<1x2x32xf32, #tpu.memory_space<vmem>>, %arg4: memref<6x32xf32, #tpu.memory_space<vmem>>, %arg5: memref<2x3x2x32x16xf32, #tpu.memory_space<vmem>>, %arg6: memref<2x2x16x32xf32, #tpu.memory_space<vmem>>, %arg7: memref<2x4x1x32xf32, #tpu.memory_space<vmem>>, %arg8: memref<2x33x64xf32, #tpu.memory_space<vmem>>, %arg9: memref<2x65x32xf32, #tpu.memory_space<vmem>>, %arg10: memref<65x32xf32, #tpu.memory_space<vmem>>, %arg11: memref<33x10xf32, #tpu.memory_space<vmem>>, %arg12: memref<1x2x10xf32, #tpu.memory_space<vmem>>) attributes {dimension_semantics = [#tpu.dimension_semantics<parallel>], iteration_bounds = array<i64: 2>, scalar_prefetch = 0 : i64, scratch_operands = 0 : i64, tpu.core_type = #tpu.core_type<tc>, window_params = [{transform_indices = @transform_0, window_bounds = array<i64: 2, 16, 32>}, {transform_indices = @transform_1, window_bounds = array<i64: 1, 1, 16>}, {transform_indices = @transform_2, window_bounds = array<i64: 1, 2, 32>}, {pipeline_mode = #tpu.pipeline_mode<synchronous>, transform_indices = @transform_3, window_bounds = array<i64: 6, 32>}, {pipeline_mode = #tpu.pipeline_mode<synchronous>, transform_indices = @transform_4, window_bounds = array<i64: 2, 3, 2, 32, 16>}, {pipeline_mode = #tpu.pipeline_mode<synchronous>, transform_indices = @transform_5, window_bounds = array<i64: 2, 2, 16, 32>}, {pipeline_mode = #tpu.pipeline_mode<synchronous>, transform_indices = @transform_6, window_bounds = array<i64: 2, 4, 1, 32>}, {pipeline_mode = #tpu.pipeline_mode<synchronous>, transform_indices = @transform_7, window_bounds = array<i64: 2, 33, 64>}, {pipeline_mode = #tpu.pipeline_mode<synchronous>, transform_indices = @transform_8, window_bounds = array<i64: 2, 65, 32>}, {pipeline_mode = #tpu.pipeline_mode<synchronous>, transform_indices = @transform_9, window_bounds = array<i64: 65, 32>}, {pipeline_mode = #tpu.pipeline_mode<synchronous>, transform_indices = @transform_10, window_bounds = array<i64: 33, 10>}, {transform_indices = @transform_11, window_bounds = array<i64: 1, 2, 10>}]} {
    %c0 = arith.constant 0 : index
    %c0_0 = arith.constant 0 : index
    %c0_1 = arith.constant 0 : index
    %0 = vector.load %arg1[%c0, %c0_0, %c0_1] : memref<2x16x32xf32, #tpu.memory_space<vmem>>, vector<1x16x32xf32>
    %1 = vector.shape_cast %0 : vector<1x16x32xf32> to vector<16x32xf32>
    %2 = math.tanh %1 : vector<16x32xf32>
    %c1 = arith.constant 1 : index
    %c0_2 = arith.constant 0 : index
    %c0_3 = arith.constant 0 : index
    %3 = vector.load %arg1[%c1, %c0_2, %c0_3] : memref<2x16x32xf32, #tpu.memory_space<vmem>>, vector<1x16x32xf32>
    %4 = vector.shape_cast %3 : vector<1x16x32xf32> to vector<16x32xf32>
    %5 = arith.addf %2, %4 : vector<16x32xf32>
    %6 = tpu.iota {dimensions = array<i32: 0>} : vector<16x16xi32>
    %7 = tpu.iota {dimensions = array<i32: 1>} : vector<16x16xi32>
    %c0_i32 = arith.constant 0 : i32
    %8 = vector.broadcast %c0_i32 : i32 to vector<16x16xi32>
    %9 = arith.cmpi sge, %6, %8 : vector<16x16xi32>
    %c8_i32 = arith.constant 8 : i32
    %10 = vector.broadcast %c8_i32 : i32 to vector<16x16xi32>
    %11 = arith.cmpi slt, %6, %10 : vector<16x16xi32>
    %12 = arith.andi %9, %11 : vector<16x16xi1>
    %c0_i32_4 = arith.constant 0 : i32
    %13 = vector.broadcast %c0_i32_4 : i32 to vector<16x16xi32>
    %14 = arith.cmpi sge, %7, %13 : vector<16x16xi32>
    %15 = arith.andi %12, %14 : vector<16x16xi1>
    %c8_i32_5 = arith.constant 8 : i32
    %16 = vector.broadcast %c8_i32_5 : i32 to vector<16x16xi32>
    %17 = arith.cmpi slt, %7, %16 : vector<16x16xi32>
    %18 = arith.andi %15, %17 : vector<16x16xi1>
    %c8_i32_6 = arith.constant 8 : i32
    %19 = vector.broadcast %c8_i32_6 : i32 to vector<16x16xi32>
    %20 = arith.cmpi sge, %6, %19 : vector<16x16xi32>
    %c16_i32 = arith.constant 16 : i32
    %21 = vector.broadcast %c16_i32 : i32 to vector<16x16xi32>
    %22 = arith.cmpi slt, %6, %21 : vector<16x16xi32>
    %23 = arith.andi %20, %22 : vector<16x16xi1>
    %c8_i32_7 = arith.constant 8 : i32
    %24 = vector.broadcast %c8_i32_7 : i32 to vector<16x16xi32>
    %25 = arith.cmpi sge, %7, %24 : vector<16x16xi32>
    %26 = arith.andi %23, %25 : vector<16x16xi1>
    %c16_i32_8 = arith.constant 16 : i32
    %27 = vector.broadcast %c16_i32_8 : i32 to vector<16x16xi32>
    %28 = arith.cmpi slt, %7, %27 : vector<16x16xi32>
    %29 = arith.andi %26, %28 : vector<16x16xi1>
    %30 = arith.ori %18, %29 : vector<16x16xi1>
    %cst = arith.constant 0.000000e+00 : f32
    %cst_9 = arith.constant -1.000000e+09 : f32
    %31 = vector.broadcast %cst : f32 to vector<16x16xf32>
    %32 = vector.broadcast %cst_9 : f32 to vector<16x16xf32>
    %33 = arith.select %30, %31, %32 : vector<16x16xi1>, vector<16x16xf32>
    %c0_10 = arith.constant 0 : index
    %c0_11 = arith.constant 0 : index
    %c0_12 = arith.constant 0 : index
    %34 = vector.load %arg2[%c0_10, %c0_11, %c0_12] : memref<1x1x16xf32, #tpu.memory_space<vmem>>, vector<1x1x16xf32>
    %35 = vector.shape_cast %34 : vector<1x1x16xf32> to vector<1x16xf32>
    %36 = vector.broadcast %35 : vector<1x16xf32> to vector<16x16xf32>
    %37 = arith.addf %33, %36 : vector<16x16xf32>
    %c0_13 = arith.constant 0 : index
    %c0_14 = arith.constant 0 : index
    %c0_15 = arith.constant 0 : index
    %c0_16 = arith.constant 0 : index
    %38 = vector.load %arg7[%c0_13, %c0_14, %c0_15, %c0_16] : memref<2x4x1x32xf32, #tpu.memory_space<vmem>>, vector<1x4x1x32xf32>
    %39 = vector.shape_cast %38 : vector<1x4x1x32xf32> to vector<4x1x32xf32>
    %cst_17 = arith.constant 0.000000e+00 : f32
    %40 = vector.broadcast %cst_17 : f32 to vector<16x32xf32>
    %c0_18 = arith.constant 0 : index
    %c0_19 = arith.constant 0 : index
    %c0_20 = arith.constant 0 : index
    %c0_21 = arith.constant 0 : index
    %c0_22 = arith.constant 0 : index
    %41 = vector.load %arg5[%c0_18, %c0_19, %c0_20, %c0_21, %c0_22] : memref<2x3x2x32x16xf32, #tpu.memory_space<vmem>>, vector<1x1x1x32x16xf32>
    %42 = vector.shape_cast %41 : vector<1x1x1x32x16xf32> to vector<32x16xf32>
    %cst_23 = arith.constant dense<0.000000e+00> : vector<16x16xf32>
    %43 = tpu.matmul %5, %42, %cst_23 {dimension_numbers = #tpu.dot_dimension_numbers<[1], [0], [0], [1], [0, 0, 1, 1], [], []>} : vector<16x32xf32>, vector<32x16xf32>, vector<16x16xf32> -> vector<16x16xf32>
    %c0_24 = arith.constant 0 : index
    %c1_25 = arith.constant 1 : index
    %c0_26 = arith.constant 0 : index
    %c0_27 = arith.constant 0 : index
    %c0_28 = arith.constant 0 : index
    %44 = vector.load %arg5[%c0_24, %c1_25, %c0_26, %c0_27, %c0_28] : memref<2x3x2x32x16xf32, #tpu.memory_space<vmem>>, vector<1x1x1x32x16xf32>
    %45 = vector.shape_cast %44 : vector<1x1x1x32x16xf32> to vector<32x16xf32>
    %cst_29 = arith.constant dense<0.000000e+00> : vector<16x16xf32>
    %46 = tpu.matmul %5, %45, %cst_29 {dimension_numbers = #tpu.dot_dimension_numbers<[1], [0], [0], [1], [0, 0, 1, 1], [], []>} : vector<16x32xf32>, vector<32x16xf32>, vector<16x16xf32> -> vector<16x16xf32>
    %c0_30 = arith.constant 0 : index
    %c2 = arith.constant 2 : index
    %c0_31 = arith.constant 0 : index
    %c0_32 = arith.constant 0 : index
    %c0_33 = arith.constant 0 : index
    %47 = vector.load %arg5[%c0_30, %c2, %c0_31, %c0_32, %c0_33] : memref<2x3x2x32x16xf32, #tpu.memory_space<vmem>>, vector<1x1x1x32x16xf32>
    %48 = vector.shape_cast %47 : vector<1x1x1x32x16xf32> to vector<32x16xf32>
    %cst_34 = arith.constant dense<0.000000e+00> : vector<16x16xf32>
    %49 = tpu.matmul %5, %48, %cst_34 {dimension_numbers = #tpu.dot_dimension_numbers<[1], [0], [0], [1], [0, 0, 1, 1], [], []>} : vector<16x32xf32>, vector<32x16xf32>, vector<16x16xf32> -> vector<16x16xf32>
    %cst_35 = arith.constant dense<0.000000e+00> : vector<16x16xf32>
    %50 = tpu.matmul %43, %46, %cst_35 {dimension_numbers = #tpu.dot_dimension_numbers<[1], [1], [0], [0], [0, 0, 1, 0], [], []>} : vector<16x16xf32>, vector<16x16xf32>, vector<16x16xf32> -> vector<16x16xf32>
    %51 = arith.addf %50, %37 : vector<16x16xf32>
    %cst_36 = arith.constant dense<0xFF800000> : vector<16xf32>
    %52 = vector.multi_reduction <maximumf>, %51, %cst_36 [1] : vector<16x16xf32> to vector<16xf32>
    %53 = vector.shape_cast %52 : vector<16xf32> to vector<16x1xf32>
    %54 = vector.broadcast %53 : vector<16x1xf32> to vector<16x16xf32>
    %55 = arith.subf %51, %54 : vector<16x16xf32>
    %56 = math.exp %55 : vector<16x16xf32>
    %cst_37 = arith.constant dense<0.000000e+00> : vector<16xf32>
    %57 = vector.multi_reduction <add>, %56, %cst_37 [1] : vector<16x16xf32> to vector<16xf32>
    %58 = vector.shape_cast %57 : vector<16xf32> to vector<16x1xf32>
    %59 = tpu.reciprocal %58 {approx = true} : vector<16x1xf32> -> vector<16x1xf32>
    %60 = vector.broadcast %59 : vector<16x1xf32> to vector<16x16xf32>
    %61 = arith.mulf %56, %60 : vector<16x16xf32>
    %cst_38 = arith.constant dense<0.000000e+00> : vector<16x16xf32>
    %62 = tpu.matmul %61, %49, %cst_38 {dimension_numbers = #tpu.dot_dimension_numbers<[1], [0], [0], [1], [0, 0, 1, 1], [], []>} : vector<16x16xf32>, vector<16x16xf32>, vector<16x16xf32> -> vector<16x16xf32>
    %c0_39 = arith.constant 0 : index
    %c0_40 = arith.constant 0 : index
    %c0_41 = arith.constant 0 : index
    %c0_42 = arith.constant 0 : index
    %63 = vector.load %arg6[%c0_39, %c0_40, %c0_41, %c0_42] : memref<2x2x16x32xf32, #tpu.memory_space<vmem>>, vector<1x1x16x32xf32>
    %64 = vector.shape_cast %63 : vector<1x1x16x32xf32> to vector<16x32xf32>
    %cst_43 = arith.constant dense<0.000000e+00> : vector<16x32xf32>
    %65 = tpu.matmul %62, %64, %cst_43 {dimension_numbers = #tpu.dot_dimension_numbers<[1], [0], [0], [1], [0, 0, 1, 1], [], []>} : vector<16x16xf32>, vector<16x32xf32>, vector<16x32xf32> -> vector<16x32xf32>
    %66 = arith.addf %40, %65 : vector<16x32xf32>
    %c0_44 = arith.constant 0 : index
    %c0_45 = arith.constant 0 : index
    %c1_46 = arith.constant 1 : index
    %c0_47 = arith.constant 0 : index
    %c0_48 = arith.constant 0 : index
    %67 = vector.load %arg5[%c0_44, %c0_45, %c1_46, %c0_47, %c0_48] : memref<2x3x2x32x16xf32, #tpu.memory_space<vmem>>, vector<1x1x1x32x16xf32>
    %68 = vector.shape_cast %67 : vector<1x1x1x32x16xf32> to vector<32x16xf32>
    %cst_49 = arith.constant dense<0.000000e+00> : vector<16x16xf32>
    %69 = tpu.matmul %5, %68, %cst_49 {dimension_numbers = #tpu.dot_dimension_numbers<[1], [0], [0], [1], [0, 0, 1, 1], [], []>} : vector<16x32xf32>, vector<32x16xf32>, vector<16x16xf32> -> vector<16x16xf32>
    %c0_50 = arith.constant 0 : index
    %c1_51 = arith.constant 1 : index
    %c1_52 = arith.constant 1 : index
    %c0_53 = arith.constant 0 : index
    %c0_54 = arith.constant 0 : index
    %70 = vector.load %arg5[%c0_50, %c1_51, %c1_52, %c0_53, %c0_54] : memref<2x3x2x32x16xf32, #tpu.memory_space<vmem>>, vector<1x1x1x32x16xf32>
    %71 = vector.shape_cast %70 : vector<1x1x1x32x16xf32> to vector<32x16xf32>
    %cst_55 = arith.constant dense<0.000000e+00> : vector<16x16xf32>
    %72 = tpu.matmul %5, %71, %cst_55 {dimension_numbers = #tpu.dot_dimension_numbers<[1], [0], [0], [1], [0, 0, 1, 1], [], []>} : vector<16x32xf32>, vector<32x16xf32>, vector<16x16xf32> -> vector<16x16xf32>
    %c0_56 = arith.constant 0 : index
    %c2_57 = arith.constant 2 : index
    %c1_58 = arith.constant 1 : index
    %c0_59 = arith.constant 0 : index
    %c0_60 = arith.constant 0 : index
    %73 = vector.load %arg5[%c0_56, %c2_57, %c1_58, %c0_59, %c0_60] : memref<2x3x2x32x16xf32, #tpu.memory_space<vmem>>, vector<1x1x1x32x16xf32>
    %74 = vector.shape_cast %73 : vector<1x1x1x32x16xf32> to vector<32x16xf32>
    %cst_61 = arith.constant dense<0.000000e+00> : vector<16x16xf32>
    %75 = tpu.matmul %5, %74, %cst_61 {dimension_numbers = #tpu.dot_dimension_numbers<[1], [0], [0], [1], [0, 0, 1, 1], [], []>} : vector<16x32xf32>, vector<32x16xf32>, vector<16x16xf32> -> vector<16x16xf32>
    %cst_62 = arith.constant dense<0.000000e+00> : vector<16x16xf32>
    %76 = tpu.matmul %69, %72, %cst_62 {dimension_numbers = #tpu.dot_dimension_numbers<[1], [1], [0], [0], [0, 0, 1, 0], [], []>} : vector<16x16xf32>, vector<16x16xf32>, vector<16x16xf32> -> vector<16x16xf32>
    %77 = arith.addf %76, %37 : vector<16x16xf32>
    %cst_63 = arith.constant dense<0xFF800000> : vector<16xf32>
    %78 = vector.multi_reduction <maximumf>, %77, %cst_63 [1] : vector<16x16xf32> to vector<16xf32>
    %79 = vector.shape_cast %78 : vector<16xf32> to vector<16x1xf32>
    %80 = vector.broadcast %79 : vector<16x1xf32> to vector<16x16xf32>
    %81 = arith.subf %77, %80 : vector<16x16xf32>
    %82 = math.exp %81 : vector<16x16xf32>
    %cst_64 = arith.constant dense<0.000000e+00> : vector<16xf32>
    %83 = vector.multi_reduction <add>, %82, %cst_64 [1] : vector<16x16xf32> to vector<16xf32>
    %84 = vector.shape_cast %83 : vector<16xf32> to vector<16x1xf32>
    %85 = tpu.reciprocal %84 {approx = true} : vector<16x1xf32> -> vector<16x1xf32>
    %86 = vector.broadcast %85 : vector<16x1xf32> to vector<16x16xf32>
    %87 = arith.mulf %82, %86 : vector<16x16xf32>
    %cst_65 = arith.constant dense<0.000000e+00> : vector<16x16xf32>
    %88 = tpu.matmul %87, %75, %cst_65 {dimension_numbers = #tpu.dot_dimension_numbers<[1], [0], [0], [1], [0, 0, 1, 1], [], []>} : vector<16x16xf32>, vector<16x16xf32>, vector<16x16xf32> -> vector<16x16xf32>
    %c0_66 = arith.constant 0 : index
    %c1_67 = arith.constant 1 : index
    %c0_68 = arith.constant 0 : index
    %c0_69 = arith.constant 0 : index
    %89 = vector.load %arg6[%c0_66, %c1_67, %c0_68, %c0_69] : memref<2x2x16x32xf32, #tpu.memory_space<vmem>>, vector<1x1x16x32xf32>
    %90 = vector.shape_cast %89 : vector<1x1x16x32xf32> to vector<16x32xf32>
    %cst_70 = arith.constant dense<0.000000e+00> : vector<16x32xf32>
    %91 = tpu.matmul %88, %90, %cst_70 {dimension_numbers = #tpu.dot_dimension_numbers<[1], [0], [0], [1], [0, 0, 1, 1], [], []>} : vector<16x16xf32>, vector<16x32xf32>, vector<16x32xf32> -> vector<16x32xf32>
    %92 = arith.addf %66, %91 : vector<16x32xf32>
    %93 = arith.addf %92, %5 : vector<16x32xf32>
    %94 = vector.extract_strided_slice %39 {offsets = [0, 0, 0], sizes = [1, 1, 32], strides = [1, 1, 1]} : vector<4x1x32xf32> to vector<1x1x32xf32>
    %95 = vector.shape_cast %94 : vector<1x1x32xf32> to vector<1x32xf32>
    %96 = vector.extract_strided_slice %39 {offsets = [1, 0, 0], sizes = [1, 1, 32], strides = [1, 1, 1]} : vector<4x1x32xf32> to vector<1x1x32xf32>
    %97 = vector.shape_cast %96 : vector<1x1x32xf32> to vector<1x32xf32>
    %cst_71 = arith.constant dense<0.000000e+00> : vector<16xf32>
    %98 = vector.multi_reduction <add>, %93, %cst_71 [1] : vector<16x32xf32> to vector<16xf32>
    %99 = vector.shape_cast %98 : vector<16xf32> to vector<16x1xf32>
    %cst_72 = arith.constant 3.200000e+01 : f32
    %100 = vector.broadcast %cst_72 : f32 to vector<16x1xf32>
    %101 = arith.divf %99, %100 : vector<16x1xf32>
    %102 = vector.broadcast %101 : vector<16x1xf32> to vector<16x32xf32>
    %103 = arith.subf %93, %102 : vector<16x32xf32>
    %104 = arith.mulf %103, %103 : vector<16x32xf32>
    %cst_73 = arith.constant dense<0.000000e+00> : vector<16xf32>
    %105 = vector.multi_reduction <add>, %104, %cst_73 [1] : vector<16x32xf32> to vector<16xf32>
    %106 = vector.shape_cast %105 : vector<16xf32> to vector<16x1xf32>
    %cst_74 = arith.constant 3.200000e+01 : f32
    %107 = vector.broadcast %cst_74 : f32 to vector<16x1xf32>
    %108 = arith.divf %106, %107 : vector<16x1xf32>
    %109 = vector.broadcast %101 : vector<16x1xf32> to vector<16x32xf32>
    %110 = arith.subf %93, %109 : vector<16x32xf32>
    %cst_75 = arith.constant 9.99999974E-6 : f32
    %111 = vector.broadcast %cst_75 : f32 to vector<16x1xf32>
    %112 = arith.addf %108, %111 : vector<16x1xf32>
    %113 = math.rsqrt %112 : vector<16x1xf32>
    %114 = vector.broadcast %113 : vector<16x1xf32> to vector<16x32xf32>
    %115 = arith.mulf %110, %114 : vector<16x32xf32>
    %116 = vector.broadcast %95 : vector<1x32xf32> to vector<16x32xf32>
    %117 = arith.mulf %115, %116 : vector<16x32xf32>
    %118 = vector.broadcast %97 : vector<1x32xf32> to vector<16x32xf32>
    %119 = arith.addf %117, %118 : vector<16x32xf32>
    %c0_76 = arith.constant 0 : index
    %c0_77 = arith.constant 0 : index
    %c0_78 = arith.constant 0 : index
    %120 = vector.load %arg8[%c0_76, %c0_77, %c0_78] : memref<2x33x64xf32, #tpu.memory_space<vmem>>, vector<1x33x64xf32>
    %121 = vector.shape_cast %120 : vector<1x33x64xf32> to vector<33x64xf32>
    %c0_79 = arith.constant 0 : index
    %c0_80 = arith.constant 0 : index
    %c0_81 = arith.constant 0 : index
    %122 = vector.load %arg9[%c0_79, %c0_80, %c0_81] : memref<2x65x32xf32, #tpu.memory_space<vmem>>, vector<1x65x32xf32>
    %123 = vector.shape_cast %122 : vector<1x65x32xf32> to vector<65x32xf32>
    %124 = vector.extract_strided_slice %121 {offsets = [0, 0], sizes = [32, 64], strides = [1, 1]} : vector<33x64xf32> to vector<32x64xf32>
    %cst_82 = arith.constant dense<0.000000e+00> : vector<16x64xf32>
    %125 = tpu.matmul %119, %124, %cst_82 {dimension_numbers = #tpu.dot_dimension_numbers<[1], [0], [0], [1], [0, 0, 1, 1], [], []>} : vector<16x32xf32>, vector<32x64xf32>, vector<16x64xf32> -> vector<16x64xf32>
    %126 = vector.extract_strided_slice %121 {offsets = [32, 0], sizes = [1, 64], strides = [1, 1]} : vector<33x64xf32> to vector<1x64xf32>
    %127 = vector.broadcast %126 : vector<1x64xf32> to vector<16x64xf32>
    %128 = arith.addf %125, %127 : vector<16x64xf32>
    %cst_83 = arith.constant 0.000000e+00 : f32
    %129 = vector.broadcast %cst_83 : f32 to vector<16x64xf32>
    %130 = arith.maximumf %128, %129 : vector<16x64xf32>
    %131 = vector.extract_strided_slice %123 {offsets = [0, 0], sizes = [64, 32], strides = [1, 1]} : vector<65x32xf32> to vector<64x32xf32>
    %cst_84 = arith.constant dense<0.000000e+00> : vector<16x32xf32>
    %132 = tpu.matmul %130, %131, %cst_84 {dimension_numbers = #tpu.dot_dimension_numbers<[1], [0], [0], [1], [0, 0, 1, 1], [], []>} : vector<16x64xf32>, vector<64x32xf32>, vector<16x32xf32> -> vector<16x32xf32>
    %133 = vector.extract_strided_slice %123 {offsets = [64, 0], sizes = [1, 32], strides = [1, 1]} : vector<65x32xf32> to vector<1x32xf32>
    %134 = vector.broadcast %133 : vector<1x32xf32> to vector<16x32xf32>
    %135 = arith.addf %132, %134 : vector<16x32xf32>
    %136 = arith.addf %135, %119 : vector<16x32xf32>
    %137 = vector.extract_strided_slice %39 {offsets = [2, 0, 0], sizes = [1, 1, 32], strides = [1, 1, 1]} : vector<4x1x32xf32> to vector<1x1x32xf32>
    %138 = vector.shape_cast %137 : vector<1x1x32xf32> to vector<1x32xf32>
    %139 = vector.extract_strided_slice %39 {offsets = [3, 0, 0], sizes = [1, 1, 32], strides = [1, 1, 1]} : vector<4x1x32xf32> to vector<1x1x32xf32>
    %140 = vector.shape_cast %139 : vector<1x1x32xf32> to vector<1x32xf32>
    %cst_85 = arith.constant dense<0.000000e+00> : vector<16xf32>
    %141 = vector.multi_reduction <add>, %136, %cst_85 [1] : vector<16x32xf32> to vector<16xf32>
    %142 = vector.shape_cast %141 : vector<16xf32> to vector<16x1xf32>
    %cst_86 = arith.constant 3.200000e+01 : f32
    %143 = vector.broadcast %cst_86 : f32 to vector<16x1xf32>
    %144 = arith.divf %142, %143 : vector<16x1xf32>
    %145 = vector.broadcast %144 : vector<16x1xf32> to vector<16x32xf32>
    %146 = arith.subf %136, %145 : vector<16x32xf32>
    %147 = arith.mulf %146, %146 : vector<16x32xf32>
    %cst_87 = arith.constant dense<0.000000e+00> : vector<16xf32>
    %148 = vector.multi_reduction <add>, %147, %cst_87 [1] : vector<16x32xf32> to vector<16xf32>
    %149 = vector.shape_cast %148 : vector<16xf32> to vector<16x1xf32>
    %cst_88 = arith.constant 3.200000e+01 : f32
    %150 = vector.broadcast %cst_88 : f32 to vector<16x1xf32>
    %151 = arith.divf %149, %150 : vector<16x1xf32>
    %152 = vector.broadcast %144 : vector<16x1xf32> to vector<16x32xf32>
    %153 = arith.subf %136, %152 : vector<16x32xf32>
    %cst_89 = arith.constant 9.99999974E-6 : f32
    %154 = vector.broadcast %cst_89 : f32 to vector<16x1xf32>
    %155 = arith.addf %151, %154 : vector<16x1xf32>
    %156 = math.rsqrt %155 : vector<16x1xf32>
    %157 = vector.broadcast %156 : vector<16x1xf32> to vector<16x32xf32>
    %158 = arith.mulf %153, %157 : vector<16x32xf32>
    %159 = vector.broadcast %138 : vector<1x32xf32> to vector<16x32xf32>
    %160 = arith.mulf %158, %159 : vector<16x32xf32>
    %161 = vector.broadcast %140 : vector<1x32xf32> to vector<16x32xf32>
    %162 = arith.addf %160, %161 : vector<16x32xf32>
    %c1_90 = arith.constant 1 : index
    %c0_91 = arith.constant 0 : index
    %c0_92 = arith.constant 0 : index
    %c0_93 = arith.constant 0 : index
    %163 = vector.load %arg7[%c1_90, %c0_91, %c0_92, %c0_93] : memref<2x4x1x32xf32, #tpu.memory_space<vmem>>, vector<1x4x1x32xf32>
    %164 = vector.shape_cast %163 : vector<1x4x1x32xf32> to vector<4x1x32xf32>
    %cst_94 = arith.constant 0.000000e+00 : f32
    %165 = vector.broadcast %cst_94 : f32 to vector<16x32xf32>
    %c1_95 = arith.constant 1 : index
    %c0_96 = arith.constant 0 : index
    %c0_97 = arith.constant 0 : index
    %c0_98 = arith.constant 0 : index
    %c0_99 = arith.constant 0 : index
    %166 = vector.load %arg5[%c1_95, %c0_96, %c0_97, %c0_98, %c0_99] : memref<2x3x2x32x16xf32, #tpu.memory_space<vmem>>, vector<1x1x1x32x16xf32>
    %167 = vector.shape_cast %166 : vector<1x1x1x32x16xf32> to vector<32x16xf32>
    %cst_100 = arith.constant dense<0.000000e+00> : vector<16x16xf32>
    %168 = tpu.matmul %162, %167, %cst_100 {dimension_numbers = #tpu.dot_dimension_numbers<[1], [0], [0], [1], [0, 0, 1, 1], [], []>} : vector<16x32xf32>, vector<32x16xf32>, vector<16x16xf32> -> vector<16x16xf32>
    %c1_101 = arith.constant 1 : index
    %c1_102 = arith.constant 1 : index
    %c0_103 = arith.constant 0 : index
    %c0_104 = arith.constant 0 : index
    %c0_105 = arith.constant 0 : index
    %169 = vector.load %arg5[%c1_101, %c1_102, %c0_103, %c0_104, %c0_105] : memref<2x3x2x32x16xf32, #tpu.memory_space<vmem>>, vector<1x1x1x32x16xf32>
    %170 = vector.shape_cast %169 : vector<1x1x1x32x16xf32> to vector<32x16xf32>
    %cst_106 = arith.constant dense<0.000000e+00> : vector<16x16xf32>
    %171 = tpu.matmul %162, %170, %cst_106 {dimension_numbers = #tpu.dot_dimension_numbers<[1], [0], [0], [1], [0, 0, 1, 1], [], []>} : vector<16x32xf32>, vector<32x16xf32>, vector<16x16xf32> -> vector<16x16xf32>
    %c1_107 = arith.constant 1 : index
    %c2_108 = arith.constant 2 : index
    %c0_109 = arith.constant 0 : index
    %c0_110 = arith.constant 0 : index
    %c0_111 = arith.constant 0 : index
    %172 = vector.load %arg5[%c1_107, %c2_108, %c0_109, %c0_110, %c0_111] : memref<2x3x2x32x16xf32, #tpu.memory_space<vmem>>, vector<1x1x1x32x16xf32>
    %173 = vector.shape_cast %172 : vector<1x1x1x32x16xf32> to vector<32x16xf32>
    %cst_112 = arith.constant dense<0.000000e+00> : vector<16x16xf32>
    %174 = tpu.matmul %162, %173, %cst_112 {dimension_numbers = #tpu.dot_dimension_numbers<[1], [0], [0], [1], [0, 0, 1, 1], [], []>} : vector<16x32xf32>, vector<32x16xf32>, vector<16x16xf32> -> vector<16x16xf32>
    %cst_113 = arith.constant dense<0.000000e+00> : vector<16x16xf32>
    %175 = tpu.matmul %168, %171, %cst_113 {dimension_numbers = #tpu.dot_dimension_numbers<[1], [1], [0], [0], [0, 0, 1, 0], [], []>} : vector<16x16xf32>, vector<16x16xf32>, vector<16x16xf32> -> vector<16x16xf32>
    %176 = arith.addf %175, %37 : vector<16x16xf32>
    %cst_114 = arith.constant dense<0xFF800000> : vector<16xf32>
    %177 = vector.multi_reduction <maximumf>, %176, %cst_114 [1] : vector<16x16xf32> to vector<16xf32>
    %178 = vector.shape_cast %177 : vector<16xf32> to vector<16x1xf32>
    %179 = vector.broadcast %178 : vector<16x1xf32> to vector<16x16xf32>
    %180 = arith.subf %176, %179 : vector<16x16xf32>
    %181 = math.exp %180 : vector<16x16xf32>
    %cst_115 = arith.constant dense<0.000000e+00> : vector<16xf32>
    %182 = vector.multi_reduction <add>, %181, %cst_115 [1] : vector<16x16xf32> to vector<16xf32>
    %183 = vector.shape_cast %182 : vector<16xf32> to vector<16x1xf32>
    %184 = tpu.reciprocal %183 {approx = true} : vector<16x1xf32> -> vector<16x1xf32>
    %185 = vector.broadcast %184 : vector<16x1xf32> to vector<16x16xf32>
    %186 = arith.mulf %181, %185 : vector<16x16xf32>
    %cst_116 = arith.constant dense<0.000000e+00> : vector<16x16xf32>
    %187 = tpu.matmul %186, %174, %cst_116 {dimension_numbers = #tpu.dot_dimension_numbers<[1], [0], [0], [1], [0, 0, 1, 1], [], []>} : vector<16x16xf32>, vector<16x16xf32>, vector<16x16xf32> -> vector<16x16xf32>
    %c1_117 = arith.constant 1 : index
    %c0_118 = arith.constant 0 : index
    %c0_119 = arith.constant 0 : index
    %c0_120 = arith.constant 0 : index
    %188 = vector.load %arg6[%c1_117, %c0_118, %c0_119, %c0_120] : memref<2x2x16x32xf32, #tpu.memory_space<vmem>>, vector<1x1x16x32xf32>
    %189 = vector.shape_cast %188 : vector<1x1x16x32xf32> to vector<16x32xf32>
    %cst_121 = arith.constant dense<0.000000e+00> : vector<16x32xf32>
    %190 = tpu.matmul %187, %189, %cst_121 {dimension_numbers = #tpu.dot_dimension_numbers<[1], [0], [0], [1], [0, 0, 1, 1], [], []>} : vector<16x16xf32>, vector<16x32xf32>, vector<16x32xf32> -> vector<16x32xf32>
    %191 = arith.addf %165, %190 : vector<16x32xf32>
    %c1_122 = arith.constant 1 : index
    %c0_123 = arith.constant 0 : index
    %c1_124 = arith.constant 1 : index
    %c0_125 = arith.constant 0 : index
    %c0_126 = arith.constant 0 : index
    %192 = vector.load %arg5[%c1_122, %c0_123, %c1_124, %c0_125, %c0_126] : memref<2x3x2x32x16xf32, #tpu.memory_space<vmem>>, vector<1x1x1x32x16xf32>
    %193 = vector.shape_cast %192 : vector<1x1x1x32x16xf32> to vector<32x16xf32>
    %cst_127 = arith.constant dense<0.000000e+00> : vector<16x16xf32>
    %194 = tpu.matmul %162, %193, %cst_127 {dimension_numbers = #tpu.dot_dimension_numbers<[1], [0], [0], [1], [0, 0, 1, 1], [], []>} : vector<16x32xf32>, vector<32x16xf32>, vector<16x16xf32> -> vector<16x16xf32>
    %c1_128 = arith.constant 1 : index
    %c1_129 = arith.constant 1 : index
    %c1_130 = arith.constant 1 : index
    %c0_131 = arith.constant 0 : index
    %c0_132 = arith.constant 0 : index
    %195 = vector.load %arg5[%c1_128, %c1_129, %c1_130, %c0_131, %c0_132] : memref<2x3x2x32x16xf32, #tpu.memory_space<vmem>>, vector<1x1x1x32x16xf32>
    %196 = vector.shape_cast %195 : vector<1x1x1x32x16xf32> to vector<32x16xf32>
    %cst_133 = arith.constant dense<0.000000e+00> : vector<16x16xf32>
    %197 = tpu.matmul %162, %196, %cst_133 {dimension_numbers = #tpu.dot_dimension_numbers<[1], [0], [0], [1], [0, 0, 1, 1], [], []>} : vector<16x32xf32>, vector<32x16xf32>, vector<16x16xf32> -> vector<16x16xf32>
    %c1_134 = arith.constant 1 : index
    %c2_135 = arith.constant 2 : index
    %c1_136 = arith.constant 1 : index
    %c0_137 = arith.constant 0 : index
    %c0_138 = arith.constant 0 : index
    %198 = vector.load %arg5[%c1_134, %c2_135, %c1_136, %c0_137, %c0_138] : memref<2x3x2x32x16xf32, #tpu.memory_space<vmem>>, vector<1x1x1x32x16xf32>
    %199 = vector.shape_cast %198 : vector<1x1x1x32x16xf32> to vector<32x16xf32>
    %cst_139 = arith.constant dense<0.000000e+00> : vector<16x16xf32>
    %200 = tpu.matmul %162, %199, %cst_139 {dimension_numbers = #tpu.dot_dimension_numbers<[1], [0], [0], [1], [0, 0, 1, 1], [], []>} : vector<16x32xf32>, vector<32x16xf32>, vector<16x16xf32> -> vector<16x16xf32>
    %cst_140 = arith.constant dense<0.000000e+00> : vector<16x16xf32>
    %201 = tpu.matmul %194, %197, %cst_140 {dimension_numbers = #tpu.dot_dimension_numbers<[1], [1], [0], [0], [0, 0, 1, 0], [], []>} : vector<16x16xf32>, vector<16x16xf32>, vector<16x16xf32> -> vector<16x16xf32>
    %202 = arith.addf %201, %37 : vector<16x16xf32>
    %cst_141 = arith.constant dense<0xFF800000> : vector<16xf32>
    %203 = vector.multi_reduction <maximumf>, %202, %cst_141 [1] : vector<16x16xf32> to vector<16xf32>
    %204 = vector.shape_cast %203 : vector<16xf32> to vector<16x1xf32>
    %205 = vector.broadcast %204 : vector<16x1xf32> to vector<16x16xf32>
    %206 = arith.subf %202, %205 : vector<16x16xf32>
    %207 = math.exp %206 : vector<16x16xf32>
    %cst_142 = arith.constant dense<0.000000e+00> : vector<16xf32>
    %208 = vector.multi_reduction <add>, %207, %cst_142 [1] : vector<16x16xf32> to vector<16xf32>
    %209 = vector.shape_cast %208 : vector<16xf32> to vector<16x1xf32>
    %210 = tpu.reciprocal %209 {approx = true} : vector<16x1xf32> -> vector<16x1xf32>
    %211 = vector.broadcast %210 : vector<16x1xf32> to vector<16x16xf32>
    %212 = arith.mulf %207, %211 : vector<16x16xf32>
    %cst_143 = arith.constant dense<0.000000e+00> : vector<16x16xf32>
    %213 = tpu.matmul %212, %200, %cst_143 {dimension_numbers = #tpu.dot_dimension_numbers<[1], [0], [0], [1], [0, 0, 1, 1], [], []>} : vector<16x16xf32>, vector<16x16xf32>, vector<16x16xf32> -> vector<16x16xf32>
    %c1_144 = arith.constant 1 : index
    %c1_145 = arith.constant 1 : index
    %c0_146 = arith.constant 0 : index
    %c0_147 = arith.constant 0 : index
    %214 = vector.load %arg6[%c1_144, %c1_145, %c0_146, %c0_147] : memref<2x2x16x32xf32, #tpu.memory_space<vmem>>, vector<1x1x16x32xf32>
    %215 = vector.shape_cast %214 : vector<1x1x16x32xf32> to vector<16x32xf32>
    %cst_148 = arith.constant dense<0.000000e+00> : vector<16x32xf32>
    %216 = tpu.matmul %213, %215, %cst_148 {dimension_numbers = #tpu.dot_dimension_numbers<[1], [0], [0], [1], [0, 0, 1, 1], [], []>} : vector<16x16xf32>, vector<16x32xf32>, vector<16x32xf32> -> vector<16x32xf32>
    %217 = arith.addf %191, %216 : vector<16x32xf32>
    %218 = arith.addf %217, %162 : vector<16x32xf32>
    %219 = vector.extract_strided_slice %164 {offsets = [0, 0, 0], sizes = [1, 1, 32], strides = [1, 1, 1]} : vector<4x1x32xf32> to vector<1x1x32xf32>
    %220 = vector.shape_cast %219 : vector<1x1x32xf32> to vector<1x32xf32>
    %221 = vector.extract_strided_slice %164 {offsets = [1, 0, 0], sizes = [1, 1, 32], strides = [1, 1, 1]} : vector<4x1x32xf32> to vector<1x1x32xf32>
    %222 = vector.shape_cast %221 : vector<1x1x32xf32> to vector<1x32xf32>
    %cst_149 = arith.constant dense<0.000000e+00> : vector<16xf32>
    %223 = vector.multi_reduction <add>, %218, %cst_149 [1] : vector<16x32xf32> to vector<16xf32>
    %224 = vector.shape_cast %223 : vector<16xf32> to vector<16x1xf32>
    %cst_150 = arith.constant 3.200000e+01 : f32
    %225 = vector.broadcast %cst_150 : f32 to vector<16x1xf32>
    %226 = arith.divf %224, %225 : vector<16x1xf32>
    %227 = vector.broadcast %226 : vector<16x1xf32> to vector<16x32xf32>
    %228 = arith.subf %218, %227 : vector<16x32xf32>
    %229 = arith.mulf %228, %228 : vector<16x32xf32>
    %cst_151 = arith.constant dense<0.000000e+00> : vector<16xf32>
    %230 = vector.multi_reduction <add>, %229, %cst_151 [1] : vector<16x32xf32> to vector<16xf32>
    %231 = vector.shape_cast %230 : vector<16xf32> to vector<16x1xf32>
    %cst_152 = arith.constant 3.200000e+01 : f32
    %232 = vector.broadcast %cst_152 : f32 to vector<16x1xf32>
    %233 = arith.divf %231, %232 : vector<16x1xf32>
    %234 = vector.broadcast %226 : vector<16x1xf32> to vector<16x32xf32>
    %235 = arith.subf %218, %234 : vector<16x32xf32>
    %cst_153 = arith.constant 9.99999974E-6 : f32
    %236 = vector.broadcast %cst_153 : f32 to vector<16x1xf32>
    %237 = arith.addf %233, %236 : vector<16x1xf32>
    %238 = math.rsqrt %237 : vector<16x1xf32>
    %239 = vector.broadcast %238 : vector<16x1xf32> to vector<16x32xf32>
    %240 = arith.mulf %235, %239 : vector<16x32xf32>
    %241 = vector.broadcast %220 : vector<1x32xf32> to vector<16x32xf32>
    %242 = arith.mulf %240, %241 : vector<16x32xf32>
    %243 = vector.broadcast %222 : vector<1x32xf32> to vector<16x32xf32>
    %244 = arith.addf %242, %243 : vector<16x32xf32>
    %c1_154 = arith.constant 1 : index
    %c0_155 = arith.constant 0 : index
    %c0_156 = arith.constant 0 : index
    %245 = vector.load %arg8[%c1_154, %c0_155, %c0_156] : memref<2x33x64xf32, #tpu.memory_space<vmem>>, vector<1x33x64xf32>
    %246 = vector.shape_cast %245 : vector<1x33x64xf32> to vector<33x64xf32>
    %c1_157 = arith.constant 1 : index
    %c0_158 = arith.constant 0 : index
    %c0_159 = arith.constant 0 : index
    %247 = vector.load %arg9[%c1_157, %c0_158, %c0_159] : memref<2x65x32xf32, #tpu.memory_space<vmem>>, vector<1x65x32xf32>
    %248 = vector.shape_cast %247 : vector<1x65x32xf32> to vector<65x32xf32>
    %249 = vector.extract_strided_slice %246 {offsets = [0, 0], sizes = [32, 64], strides = [1, 1]} : vector<33x64xf32> to vector<32x64xf32>
    %cst_160 = arith.constant dense<0.000000e+00> : vector<16x64xf32>
    %250 = tpu.matmul %244, %249, %cst_160 {dimension_numbers = #tpu.dot_dimension_numbers<[1], [0], [0], [1], [0, 0, 1, 1], [], []>} : vector<16x32xf32>, vector<32x64xf32>, vector<16x64xf32> -> vector<16x64xf32>
    %251 = vector.extract_strided_slice %246 {offsets = [32, 0], sizes = [1, 64], strides = [1, 1]} : vector<33x64xf32> to vector<1x64xf32>
    %252 = vector.broadcast %251 : vector<1x64xf32> to vector<16x64xf32>
    %253 = arith.addf %250, %252 : vector<16x64xf32>
    %cst_161 = arith.constant 0.000000e+00 : f32
    %254 = vector.broadcast %cst_161 : f32 to vector<16x64xf32>
    %255 = arith.maximumf %253, %254 : vector<16x64xf32>
    %256 = vector.extract_strided_slice %248 {offsets = [0, 0], sizes = [64, 32], strides = [1, 1]} : vector<65x32xf32> to vector<64x32xf32>
    %cst_162 = arith.constant dense<0.000000e+00> : vector<16x32xf32>
    %257 = tpu.matmul %255, %256, %cst_162 {dimension_numbers = #tpu.dot_dimension_numbers<[1], [0], [0], [1], [0, 0, 1, 1], [], []>} : vector<16x64xf32>, vector<64x32xf32>, vector<16x32xf32> -> vector<16x32xf32>
    %258 = vector.extract_strided_slice %248 {offsets = [64, 0], sizes = [1, 32], strides = [1, 1]} : vector<65x32xf32> to vector<1x32xf32>
    %259 = vector.broadcast %258 : vector<1x32xf32> to vector<16x32xf32>
    %260 = arith.addf %257, %259 : vector<16x32xf32>
    %261 = arith.addf %260, %244 : vector<16x32xf32>
    %262 = vector.extract_strided_slice %164 {offsets = [2, 0, 0], sizes = [1, 1, 32], strides = [1, 1, 1]} : vector<4x1x32xf32> to vector<1x1x32xf32>
    %263 = vector.shape_cast %262 : vector<1x1x32xf32> to vector<1x32xf32>
    %264 = vector.extract_strided_slice %164 {offsets = [3, 0, 0], sizes = [1, 1, 32], strides = [1, 1, 1]} : vector<4x1x32xf32> to vector<1x1x32xf32>
    %265 = vector.shape_cast %264 : vector<1x1x32xf32> to vector<1x32xf32>
    %cst_163 = arith.constant dense<0.000000e+00> : vector<16xf32>
    %266 = vector.multi_reduction <add>, %261, %cst_163 [1] : vector<16x32xf32> to vector<16xf32>
    %267 = vector.shape_cast %266 : vector<16xf32> to vector<16x1xf32>
    %cst_164 = arith.constant 3.200000e+01 : f32
    %268 = vector.broadcast %cst_164 : f32 to vector<16x1xf32>
    %269 = arith.divf %267, %268 : vector<16x1xf32>
    %270 = vector.broadcast %269 : vector<16x1xf32> to vector<16x32xf32>
    %271 = arith.subf %261, %270 : vector<16x32xf32>
    %272 = arith.mulf %271, %271 : vector<16x32xf32>
    %cst_165 = arith.constant dense<0.000000e+00> : vector<16xf32>
    %273 = vector.multi_reduction <add>, %272, %cst_165 [1] : vector<16x32xf32> to vector<16xf32>
    %274 = vector.shape_cast %273 : vector<16xf32> to vector<16x1xf32>
    %cst_166 = arith.constant 3.200000e+01 : f32
    %275 = vector.broadcast %cst_166 : f32 to vector<16x1xf32>
    %276 = arith.divf %274, %275 : vector<16x1xf32>
    %277 = vector.broadcast %269 : vector<16x1xf32> to vector<16x32xf32>
    %278 = arith.subf %261, %277 : vector<16x32xf32>
    %cst_167 = arith.constant 9.99999974E-6 : f32
    %279 = vector.broadcast %cst_167 : f32 to vector<16x1xf32>
    %280 = arith.addf %276, %279 : vector<16x1xf32>
    %281 = math.rsqrt %280 : vector<16x1xf32>
    %282 = vector.broadcast %281 : vector<16x1xf32> to vector<16x32xf32>
    %283 = arith.mulf %278, %282 : vector<16x32xf32>
    %284 = vector.broadcast %263 : vector<1x32xf32> to vector<16x32xf32>
    %285 = arith.mulf %283, %284 : vector<16x32xf32>
    %286 = vector.broadcast %265 : vector<1x32xf32> to vector<16x32xf32>
    %287 = arith.addf %285, %286 : vector<16x32xf32>
    %288 = vector.shape_cast %287 : vector<16x32xf32> to vector<2x8x32xf32>
    %cst_168 = arith.constant dense<0.000000e+00> : vector<2x32xf32>
    %289 = vector.multi_reduction <add>, %288, %cst_168 [1] : vector<2x8x32xf32> to vector<2x32xf32>
    %cst_169 = arith.constant 8.000000e+00 : f32
    %290 = vector.broadcast %cst_169 : f32 to vector<2x32xf32>
    %291 = arith.divf %289, %290 : vector<2x32xf32>
    %c0_170 = arith.constant 0 : index
    %c0_171 = arith.constant 0 : index
    %292 = vector.load %arg4[%c0_170, %c0_171] : memref<6x32xf32, #tpu.memory_space<vmem>>, vector<6x32xf32>
    %c0_172 = arith.constant 0 : index
    %c0_173 = arith.constant 0 : index
    %c0_174 = arith.constant 0 : index
    %293 = vector.load %arg3[%c0_172, %c0_173, %c0_174] : memref<1x2x32xf32, #tpu.memory_space<vmem>>, vector<1x2x32xf32>
    %294 = vector.shape_cast %293 : vector<1x2x32xf32> to vector<2x32xf32>
    %cst_175 = arith.constant dense<0.000000e+00> : vector<2x6xf32>
    %295 = tpu.matmul %294, %292, %cst_175 {dimension_numbers = #tpu.dot_dimension_numbers<[1], [1], [0], [0], [0, 0, 1, 0], [], []>} : vector<2x32xf32>, vector<6x32xf32>, vector<2x6xf32> -> vector<2x6xf32>
    %cst_176 = arith.constant dense<0xFF800000> : vector<2xf32>
    %296 = vector.multi_reduction <maximumf>, %295, %cst_176 [1] : vector<2x6xf32> to vector<2xf32>
    %cst_177 = arith.constant 0xFF800000 : f32
    %297 = vector.broadcast %cst_177 : f32 to vector<2xf32>
    %298 = arith.maximumf %297, %296 : vector<2xf32>
    %299 = vector.shape_cast %298 : vector<2xf32> to vector<2x1xf32>
    %300 = vector.broadcast %299 : vector<2x1xf32> to vector<2x6xf32>
    %301 = arith.subf %295, %300 : vector<2x6xf32>
    %302 = math.exp %301 : vector<2x6xf32>
    %cst_178 = arith.constant dense<0.000000e+00> : vector<2xf32>
    %303 = vector.multi_reduction <add>, %302, %cst_178 [1] : vector<2x6xf32> to vector<2xf32>
    %304 = vector.shape_cast %303 : vector<2xf32> to vector<2x1xf32>
    %305 = vector.broadcast %304 : vector<2x1xf32> to vector<2x6xf32>
    %306 = arith.divf %302, %305 : vector<2x6xf32>
    %cst_179 = arith.constant dense<0.000000e+00> : vector<2x32xf32>
    %307 = tpu.matmul %306, %292, %cst_179 {dimension_numbers = #tpu.dot_dimension_numbers<[1], [0], [0], [1], [0, 0, 1, 1], [], []>} : vector<2x6xf32>, vector<6x32xf32>, vector<2x32xf32> -> vector<2x32xf32>
    %c0_180 = arith.constant 0 : index
    %c0_181 = arith.constant 0 : index
    %308 = vector.load %arg10[%c0_180, %c0_181] : memref<65x32xf32, #tpu.memory_space<vmem>>, vector<65x32xf32>
    %c0_182 = arith.constant 0 : index
    %c0_183 = arith.constant 0 : index
    %309 = vector.load %arg11[%c0_182, %c0_183] : memref<33x10xf32, #tpu.memory_space<vmem>>, vector<33x10xf32>
    %310 = vector.extract_strided_slice %308 {offsets = [0, 0], sizes = [32, 32], strides = [1, 1]} : vector<65x32xf32> to vector<32x32xf32>
    %cst_184 = arith.constant dense<0.000000e+00> : vector<2x32xf32>
    %311 = tpu.matmul %291, %310, %cst_184 {dimension_numbers = #tpu.dot_dimension_numbers<[1], [0], [0], [1], [0, 0, 1, 1], [], []>} : vector<2x32xf32>, vector<32x32xf32>, vector<2x32xf32> -> vector<2x32xf32>
    %312 = vector.extract_strided_slice %308 {offsets = [32, 0], sizes = [32, 32], strides = [1, 1]} : vector<65x32xf32> to vector<32x32xf32>
    %cst_185 = arith.constant dense<0.000000e+00> : vector<2x32xf32>
    %313 = tpu.matmul %307, %312, %cst_185 {dimension_numbers = #tpu.dot_dimension_numbers<[1], [0], [0], [1], [0, 0, 1, 1], [], []>} : vector<2x32xf32>, vector<32x32xf32>, vector<2x32xf32> -> vector<2x32xf32>
    %314 = arith.addf %311, %313 : vector<2x32xf32>
    %315 = vector.extract_strided_slice %308 {offsets = [64, 0], sizes = [1, 32], strides = [1, 1]} : vector<65x32xf32> to vector<1x32xf32>
    %316 = vector.broadcast %315 : vector<1x32xf32> to vector<2x32xf32>
    %317 = arith.addf %314, %316 : vector<2x32xf32>
    %cst_186 = arith.constant 0.000000e+00 : f32
    %318 = vector.broadcast %cst_186 : f32 to vector<2x32xf32>
    %319 = arith.maximumf %317, %318 : vector<2x32xf32>
    %320 = vector.extract_strided_slice %309 {offsets = [0, 0], sizes = [32, 10], strides = [1, 1]} : vector<33x10xf32> to vector<32x10xf32>
    %cst_187 = arith.constant dense<0.000000e+00> : vector<2x10xf32>
    %321 = tpu.matmul %319, %320, %cst_187 {dimension_numbers = #tpu.dot_dimension_numbers<[1], [0], [0], [1], [0, 0, 1, 1], [], []>} : vector<2x32xf32>, vector<32x10xf32>, vector<2x10xf32> -> vector<2x10xf32>
    %322 = vector.extract_strided_slice %309 {offsets = [32, 0], sizes = [1, 10], strides = [1, 1]} : vector<33x10xf32> to vector<1x10xf32>
    %323 = vector.broadcast %322 : vector<1x10xf32> to vector<2x10xf32>
    %324 = arith.addf %321, %323 : vector<2x10xf32>
    %cst_188 = arith.constant dense<0xFF800000> : vector<2xf32>
    %325 = vector.multi_reduction <maximumf>, %324, %cst_188 [1] : vector<2x10xf32> to vector<2xf32>
    %cst_189 = arith.constant 0xFF800000 : f32
    %326 = vector.broadcast %cst_189 : f32 to vector<2xf32>
    %327 = arith.maximumf %326, %325 : vector<2xf32>
    %328 = vector.shape_cast %327 : vector<2xf32> to vector<2x1xf32>
    %329 = vector.broadcast %328 : vector<2x1xf32> to vector<2x10xf32>
    %330 = arith.subf %324, %329 : vector<2x10xf32>
    %331 = math.exp %330 : vector<2x10xf32>
    %cst_190 = arith.constant dense<0.000000e+00> : vector<2xf32>
    %332 = vector.multi_reduction <add>, %331, %cst_190 [1] : vector<2x10xf32> to vector<2xf32>
    %333 = vector.shape_cast %332 : vector<2xf32> to vector<2x1xf32>
    %334 = math.log %333 : vector<2x1xf32>
    %335 = vector.broadcast %334 : vector<2x1xf32> to vector<2x10xf32>
    %336 = arith.subf %330, %335 : vector<2x10xf32>
    %c0_191 = arith.constant 0 : index
    %c0_192 = arith.constant 0 : index
    %c0_193 = arith.constant 0 : index
    %337 = vector.load %arg12[%c0_191, %c0_192, %c0_193] : memref<1x2x10xf32, #tpu.memory_space<vmem>>, vector<1x2x10xf32>
    %338 = vector.shape_cast %337 : vector<1x2x10xf32> to vector<2x10xf32>
    %339 = vector.shape_cast %336 : vector<2x10xf32> to vector<1x2x10xf32>
    tpu.vector_store %arg12[%c0_191, %c0_192, %c0_193], %339 {strides = array<i32>} : memref<1x2x10xf32, #tpu.memory_space<vmem>>, vector<1x2x10xf32>,
    return
  }
  func.func @transform_0(%arg0: i32) -> (i32, i32, i32) {
    %c0_i32 = arith.constant 0 : i32
    %c0_i32_0 = arith.constant 0 : i32
    %c0_i32_1 = arith.constant 0 : i32
    return %c0_i32, %arg0, %c0_i32_0 : i32, i32, i32
  }
  func.func @transform_1(%arg0: i32) -> (i32, i32, i32) {
    %c0_i32 = arith.constant 0 : i32
    %c0_i32_0 = arith.constant 0 : i32
    %c0_i32_1 = arith.constant 0 : i32
    return %arg0, %c0_i32, %c0_i32_0 : i32, i32, i32
  }
  func.func @transform_2(%arg0: i32) -> (i32, i32, i32) {
    %c0_i32 = arith.constant 0 : i32
    %c0_i32_0 = arith.constant 0 : i32
    %c0_i32_1 = arith.constant 0 : i32
    return %arg0, %c0_i32, %c0_i32_0 : i32, i32, i32
  }
  func.func @transform_3(%arg0: i32) -> (i32, i32) {
    %c0_i32 = arith.constant 0 : i32
    %c0_i32_0 = arith.constant 0 : i32
    %c0_i32_1 = arith.constant 0 : i32
    return %c0_i32, %c0_i32_0 : i32, i32
  }
  func.func @transform_4(%arg0: i32) -> (i32, i32, i32, i32, i32) {
    %c0_i32 = arith.constant 0 : i32
    %c0_i32_0 = arith.constant 0 : i32
    %c0_i32_1 = arith.constant 0 : i32
    %c0_i32_2 = arith.constant 0 : i32
    %c0_i32_3 = arith.constant 0 : i32
    %c0_i32_4 = arith.constant 0 : i32
    return %c0_i32, %c0_i32_0, %c0_i32_1, %c0_i32_2, %c0_i32_3 : i32, i32, i32, i32, i32
  }
  func.func @transform_5(%arg0: i32) -> (i32, i32, i32, i32) {
    %c0_i32 = arith.constant 0 : i32
    %c0_i32_0 = arith.constant 0 : i32
    %c0_i32_1 = arith.constant 0 : i32
    %c0_i32_2 = arith.constant 0 : i32
    %c0_i32_3 = arith.constant 0 : i32
    return %c0_i32, %c0_i32_0, %c0_i32_1, %c0_i32_2 : i32, i32, i32, i32
  }
  func.func @transform_6(%arg0: i32) -> (i32, i32, i32, i32) {
    %c0_i32 = arith.constant 0 : i32
    %c0_i32_0 = arith.constant 0 : i32
    %c0_i32_1 = arith.constant 0 : i32
    %c0_i32_2 = arith.constant 0 : i32
    %c0_i32_3 = arith.constant 0 : i32
    return %c0_i32, %c0_i32_0, %c0_i32_1, %c0_i32_2 : i32, i32, i32, i32
  }
  func.func @transform_7(%arg0: i32) -> (i32, i32, i32) {
    %c0_i32 = arith.constant 0 : i32
    %c0_i32_0 = arith.constant 0 : i32
    %c0_i32_1 = arith.constant 0 : i32
    %c0_i32_2 = arith.constant 0 : i32
    return %c0_i32, %c0_i32_0, %c0_i32_1 : i32, i32, i32
  }
  func.func @transform_8(%arg0: i32) -> (i32, i32, i32) {
    %c0_i32 = arith.constant 0 : i32
    %c0_i32_0 = arith.constant 0 : i32
    %c0_i32_1 = arith.constant 0 : i32
    %c0_i32_2 = arith.constant 0 : i32
    return %c0_i32, %c0_i32_0, %c0_i32_1 : i32, i32, i32
  }
  func.func @transform_9(%arg0: i32) -> (i32, i32) {
    %c0_i32 = arith.constant 0 : i32
    %c0_i32_0 = arith.constant 0 : i32
    %c0_i32_1 = arith.constant 0 : i32
    return %c0_i32, %c0_i32_0 : i32, i32
  }
  func.func @transform_10(%arg0: i32) -> (i32, i32) {
    %c0_i32 = arith.constant 0 : i32
    %c0_i32_0 = arith.constant 0 : i32
    %c0_i32_1 = arith.constant 0 : i32
    return %c0_i32, %c0_i32_0 : i32, i32
  }
  func.func @transform_11(%arg0: i32) -> (i32, i32, i32) {
    %c0_i32 = arith.constant 0 : i32
    %c0_i32_0 = arith.constant 0 : i32
    %c0_i32_1 = arith.constant 0 : i32
    return %arg0, %c0_i32, %c0_i32_0 : i32, i32, i32
  }
}

</mosaic_0001>

<bundles_post_ra>
// kernel: tpu_custom_call.1
= control target key start
LH: loop header
LB: loop body
LE: loop exit
PB: predicated region body
PF: predicated region fallthrough
CT: control target
= control target key end

     0   :  { %s3062_s0 = inlined_call_operand.vmem [shape: f32[2,32,32], index: 0, kind: input, shape index: {}]   ;;  %s3063_s1 = inlined_call_operand.vmem [shape: f32[2,1,16], index: 1, kind: input, shape index: {}]   ;;  %s3064_s2 = inlined_call_operand.vmem [shape: f32[2,2,32], index: 2, kind: input, shape index: {}]   ;;  %s3065_s3 = inlined_call_operand.vmem [shape: f32[6,32], index: 3, kind: input, shape index: {}]   ;;  %s3066_s4 = inlined_call_operand.vmem [shape: f32[2,3,2,32,16], index: 4, kind: input, shape index: {}]   ;;  %s3067_s5 = inlined_call_operand.vmem [shape: f32[2,2,16,32], index: 5, kind: input, shape index: {}]   ;;  %s3068_s6 = inlined_call_operand.vmem [shape: f32[2,4,1,32], index: 6, kind: input, shape index: {}]   ;;  %s3069_s7 = inlined_call_operand.vmem [shape: f32[2,33,64], index: 7, kind: input, shape index: {}]   ;;  %s3070_s8 = inlined_call_operand.vmem [shape: f32[2,65,32], index: 8, kind: input, shape index: {}]   ;;  %s3071_s9 = inlined_call_operand.vmem [shape: f32[65,32], index: 9, kind: input, shape index: {}]   ;;  %s3072_s10 = inlined_call_operand.vmem [shape: f32[33,10], index: 10, kind: input, shape index: {}]   ;;  %s3073_s11 = inlined_call_operand.hbm [shape: f32[2,2,10], index: 11, kind: output, shape index: {}]  }
   0x1   :  { %3075 = sst [smem:[#allocation8_spill]] %s3062_s0 }
   0x2   :  { %16 = vsyncpa [#allocation4], 0 }
   0x3   :  { %18 = vsyncpa [#allocation4 + $0x1], 0  ;;  %s2441_s17 = smov 0   ;;  %s2443_s18 = smov 0  }
   0x4   :  { %s2445_s19 = smov 0   ;;  %s2447_s20 = smov 0  }
   0x5 LB: > { %3076 = sst [smem:[#allocation6_spill]] %s2372_s19  ;;  %s2462_s21 = sadd.s32 4294967295, %s2376_s20   ;;  %s2376_s20 = sphi %s2447_s20, %s3085_s20   ;;  %s2372_s19 = sphi %s2445_s19, %s3082_s19   ;;  %s2368_s18 = sphi %s2443_s18, %s3084_s18   ;;  %s2364_s17 = sphi %s2441_s17, %s3083_s17  }
   0x6   : > { %s2037_s22 = sadd.s32 4294967294, %s2376_s20   ;;  %s2466_s23 = sadd.s32 1, %s2376_s20  }
   0x7   : > { %s31_s24 = sadd.s32 1, %s2372_s19  ;;  %s28_s25 = ssub.s32 %s2376_s20, %s2466_s23 }
   0x8   : > { %p38_p0 = scmp.ne.s32.totalorder %s2372_s19, %s2368_s18  ;;  %p29_p1 = scmp.eq.s32.totalorder %s28_s25, 0 }
   0x9   : > { %p39_p2 = scmp.eq.s32.totalorder %s2376_s20, 0  ;;  %p288_p3 = scmp.eq.s32.totalorder %s2462_s21, 1 }
   0xa   : > { %p293_p4 = scmp.ne.s32.totalorder %s2368_s18, %s2364_s17  ;;  %p294_p7 = scmp.eq.s32.totalorder %s2037_s22, 1 }
   0xb   : > { %s2478_s26 = scalar_select %p29_p1, %s2372_s19, %s31_s24  }
   0xc   : > { %p40_p5 = por %p39_p2, %p38_p0  ;;  %p2480_p6 = por %p288_p3, %p38_p0 }
   0xd   : > { %3077 = sst [smem:[#allocation7_spill]] %s2478_s26  ;;  %p2484_p8 = por %p294_p7, %p293_p4 }
   0xe   : > { %p2039_p9 = scmp.ge.s32.totalorder %s2376_s20, 2 }
  0x10   : > { %334 = sbr.rel (%p2039_p9) target bundleno = 35 (0x23), region = 48 }
  0x15   : > { %337 = sbr.rel (!%p40_p5) target bundleno = 35 (0x23), region = 52  ;;  %s339_s29 = sand.u32 (%p40_p5), 1, %s2372_s19  }
  0x16   : > { %s2192_s30 = sshll.u32 (%p40_p5), %s2376_s20, 4  ;;  %s2040_s12 = sshll.u32 (%p40_p5), %s339_s29, 5 }
  0x17   : > { %s3080_s0 = sld [smem:[#allocation8_spill]] (%p40_p5)  ;;  %s341_s16 = scalar_lea.vmem (%p40_p5), [#allocation2], %s2040_s12 }
  0x1d   : > { %s344_s15 = scalar_lea.vmem %s3080_s0, %s2192_s30 }
  0x1e   : > { %v379_v0 = vld [vmem:[%s344_s15] sm:$0xff]  ;;  %v381_v1 = vld [vmem:[%s344_s15 + $0x8] sm:$0xff] }
  0x1f   : > { %v383_v2 = vld [vmem:[%s344_s15 + $0x20] sm:$0xff]  ;;  %380 = vst [vmem:[%s341_s16] sm:$0xff] %v379_v0  ;;  %v385_v3 = vld [vmem:[%s344_s15 + $0x28] sm:$0xff] }
  0x20   : > { %382 = vst [vmem:[%s341_s16 + $0x8] sm:$0xff] %v381_v1 }
  0x21   : > { %384 = vst [vmem:[%s341_s16 + $0x10] sm:$0xff] %v383_v2 }
  0x22   : > { %386 = vst [vmem:[%s341_s16 + $0x18] sm:$0xff] %v385_v3 }
  0x23 PF: > { %p2043_p10 = scmp.ge.s32.totalorder %s2376_s20, 1  ;;  %p404_p11 = scmp.lt.s32.totalorder %s2376_s20, 3 }
  0x25   : > { %p405_p12 = pnand %p2043_p10, %p404_p11 }
  0x26   : > { %s2505_s30 = sand.u32 (!%p405_p12), 1, %s2368_s18   ;;  %p458_p13 = scmp.lt.s32.totalorder (!%p405_p12), %s2462_s21, 1 }
  0x27   : > { %408 = sbr.rel (%p405_p12) target bundleno = 4593 (0x11f1), region = 98  ;;  %s2044_s12 = sshll.u32 (!%p405_p12), %s2505_s30, 5 }
  0x28   : > { %s413_s29 = scalar_lea.vmem (!%p405_p12), [#allocation2], %s2044_s12  ;;  %s2045_s26 = sshll.u32 (!%p405_p12), %s2505_s30, 1 }
  0x29   : > { %s2189_s15 = sshll.u32 (!%p405_p12), %s2462_s21, 1 }
  0x2a   : > { %s1946_s24 = scalar_lea.hbm (!%p405_p12), %s3073_s11, %s2189_s15 }
  0x2c   : > { %v2054_v4 = vld [vmem:[%s3066_s4 + $0x58] sm:$0xff]  ;;  %v2053_v5 = vld [vmem:[%s3066_s4 + $0x50] sm:$0xff]  ;;  %v2052_v8 = vld [vmem:[%s3066_s4 + $0x48] sm:$0xff]  ;;  %vm521_vm0 = vcmask 261120   ;;  %s2540_s0 = scalar_select %p458_p13, %s2462_s21, 1  ;;  %vm607_vm1 = vcmask 130048   ;;  %v477_v27 = vlaneseq }
  0x2d   : > { %568 = vmatpush.msra.mxu1 %v2054_v4  ;;  %v520_v6 = vld [vmem:[%s3066_s4 + $0x18] sm:$0xff]  ;;  %v519_v7 = vld [vmem:[%s3066_s4 + $0x10] sm:$0xff]  ;;  %v2051_v9 = vld [vmem:[%s3066_s4 + $0x40] sm:$0xff]  ;;  %v2378_v35 = vmov -1e+09   ;;  %vm1037_vm13 = vcmask 523264  }
  0x2e   : > { %540 = vmatpush.msra.mxu0 %v520_v6  ;;  %v465_v10 = vld [vmem:[%s413_s29] sm:$0xff]  ;;  %v518_v11 = vld [vmem:[%s3066_s4 + $0x8] sm:$0xff]  ;;  %v2047_v14 = vld [vmem:[%s413_s29 + $0x10] sm:$0xff]  ;;  %s460_s12 = scalar_lea.vmem %s3063_s1, %s2540_s0  ;;  %v478_v30 = vand.u32 127, %v477_v27  ;;  %s2046_s16 = sshll.u32 %s2540_s0, 1 }
  0x2f   : > { %569 = vmatpush.msra.mxu1 %v2053_v5  ;;  %v517_v12 = vld [vmem:[%s3066_s4] sm:$0xff]  ;;  %2250 = vtanh.f32 %v465_v10  ;;  %v466_v13 = vld [vmem:[%s413_s29 + $0x8] sm:$0xff]  ;;  %v2048_v18 = vld [vmem:[%s413_s29 + $0x18] sm:$0xff]  ;;  %s464_s25 = scalar_lea.vmem %s3064_s2, %s2046_s16  ;;  %s1936_s0 = scalar_lea.sflag [#allocation4], %s2505_s30 }
  0x30   : > { %541 = vmatpush.msra.mxu0 %v519_v7  ;;  %2252 = vtanh.f32 %v466_v13  ;;  %v2060_v24 = vld [vmem:[%s3066_s4 + $0x98] sm:$0xff]  ;;  %v2059_v25 = vld [vmem:[%s3066_s4 + $0x90] sm:$0xff]  ;;  %v2058_v26 = vld [vmem:[%s3066_s4 + $0x88] sm:$0xff]  ;;  %vm488_vm2 = vcmp.lt.s32.totalorder %v478_v30, 8  ;;  %vm497_vm3 = vcmp.ge.s32.totalorder %v478_v30, 8  ;;  %vm500_vm4 = vcmp.lt.s32.totalorder %v478_v30, 16 }
  0x31   : > { %570 = vmatpush.msra.mxu1 %v2052_v8  ;;  %596 = vmatpush.msra.mxu2 %v2060_v24  ;;  %v2057_v28 = vld [vmem:[%s3066_s4 + $0x80] sm:$0xff]  ;;  %v2078_v29 = vld [vmem:[%s3066_s4 + $0x78] sm:$0xff]  ;;  %v2077_v31 = vld [vmem:[%s3066_s4 + $0x70] sm:$0xff]  ;;  %v505_v36 = vsel %vm488_vm2, 0.0, %v2378_v35 }
  0x32   : > { %542 = vmatpush.msra.mxu0 %v518_v11  ;;  %v2076_v32 = vld [vmem:[%s3066_s4 + $0x68] sm:$0xff]  ;;  %v2075_v33 = vld [vmem:[%s3066_s4 + $0x60] sm:$0xff]  ;;  %vm502_vm5 = vmand %vm497_vm3, %vm500_vm4 }
  0x33   : > { %571 = vmatpush.msra.mxu1 %v2051_v9  ;;  %597 = vmatpush.msra.mxu2 %v2059_v25  ;;  %v2235_v34 = vld [vmem:[%s460_s12] ss:$0 sm:$0xff]  ;;  %v506_v40 = vsel %vm502_vm5, 0.0, %v2378_v35  ;;  %v2072_v46 = vld [vmem:[%s3066_s4 + $0x38] sm:$0xff]  ;;  %v2071_v47 = vld [vmem:[%s3066_s4 + $0x30] sm:$0xff]  ;;  %s1950_s12 = sshll.u32 %s1946_s24, 4  ;;  %s1951_s12 = int_to_ptr.hbm [resolvable:$true] %s1950_s12 }
  0x34   : > { %543 = vmatpush.msra.mxu0 %v517_v12  ;;  %v2578_v37 = vadd.f32 %v2235_v34, %v505_v36  ;;  %v2584_v42 = vadd.f32 %v2235_v34, %v506_v40  ;;  %v2070_v48 = vld [vmem:[%s3066_s4 + $0x28] sm:$0xff]  ;;  %v2069_v49 = vld [vmem:[%s3066_s4 + $0x20] sm:$0xff]  ;;  %v2084_v1 = vld [vmem:[%s3066_s4 + $0xb8] sm:$0xff]  ;;  %s2328_s13 = sshra.s32 %s1951_s12, 4  ;;  %s2329_s13 = int_to_ptr.hbm [resolvable:$true] %s2328_s13 }
  0x35   : > { %v2251_v15 = vpop.eup %2250  ;;  %598 = vmatpush.msra.mxu2 %v2058_v26  ;;  %713 = vmatpush.msrb.mxu1 %v2072_v46  ;;  %v2083_v2 = vld [vmem:[%s3066_s4 + $0xb0] sm:$0xff]  ;;  %v2082_v3 = vld [vmem:[%s3066_s4 + $0xa8] sm:$0xff]  ;;  %v2081_v4 = vld [vmem:[%s3066_s4 + $0xa0] sm:$0xff]  ;;  %s2330_s14 = scalar_lea.hbm %s2329_s13, 2  ;;  %p2335_p3 = scmp.lt.s32.totalorder %s2329_s13, %s3073_s11 }
  0x36   : > { %v2526_v16 = vadd.f32 %v2251_v15, %v2047_v14  ;;  %v2253_v17 = vpop.eup %2252  ;;  %v695_v8 = vld [vmem:[%s3067_s5 + $0x8] sm:$0xff]  ;;  %v694_v13 = vld [vmem:[%s3067_s5] sm:$0xff]  ;;  %v2094_v36 = vld [vmem:[%s3067_s5 + $0x18] sm:$0xff]  ;;  %p2331_p0 = scmp.ne.s32.totalorder %s2329_s13, %s2330_s14 }
  0x37   : > { %v2532_v19 = vadd.f32 %v2253_v17, %v2048_v18  ;;  %599 = vmatpush.msra.mxu2 %v2057_v28  ;;  %714 = vmatpush.msrb.mxu1 %v2071_v47 }
  0x38   : > { %2055 = vmatmul.msk.f32.vlgmr.msra.gmra.mxu1 %vm521_vm0, %v2526_v16  ;;  %2049 = vmatmul.msk.f32.vlgmr.msra.gmra.mxu0 %vm521_vm0, %v2526_v16  ;;  %p2332_p1 = pnand %p2331_p0, %p2480_p6 }
  0x39   : > { %2061 = vmatmul.msk.f32.vlgmr.msra.gmra.mxu2 %vm521_vm0, %v2526_v16  ;;  %715 = vmatpush.msrb.mxu1 %v2070_v48 }
  0x3a   : > { %741 = vmatpush.msrb.mxu2 %v2078_v29  ;;  %p2333_p2 = pneg %p2332_p1 }
  0x3b   : > { %716 = vmatpush.msrb.mxu1 %v2069_v49 }
  0x3c   : > { %742 = vmatpush.msrb.mxu2 %v2077_v31 }
  0x3e   : > { %743 = vmatpush.msrb.mxu2 %v2076_v32 }
  0x40   : > { %2056 = vmatmul.msk.f32.gmra.mxu1 %vm521_vm0, %v2532_v19  ;;  %2050 = vmatmul.msk.f32.gmra.mxu0 %vm521_vm0, %v2532_v19 }
  0x41   : > { %744 = vmatpush.msrb.mxu2 %v2075_v33 }
  0x42   : > { %2062 = vmatmul.msk.f32.gmra.mxu2 %vm521_vm0, %v2532_v19 }
  0x43   : > { %889 = vmatpush.msra.mxu2 %v2094_v36 }
  0x48   : > { %2073 = vmatmul.msk.f32.vlgmr.msrb.gmra.mxu1 %vm521_vm0, %v2526_v16 }
  0x4a   : > { %2079 = vmatmul.msk.f32.vlgmr.msrb.gmra.mxu2 %vm521_vm0, %v2526_v16 }
  0x50   : > { %2074 = vmatmul.msk.f32.gmra.mxu1 %vm521_vm0, %v2532_v19 }
  0x52   : > { %2080 = vmatmul.msk.f32.gmra.mxu2 %vm521_vm0, %v2532_v19 }
  0xb5   : > { %v573_v20 = vpop.f32.mrf.mxu1  ;;  %v545_v22 = vpop.f32.mrf.mxu0 }
  0xbc   : > { %v601_v51 = vpop.f32.mrf.mxu2 }
  0xbd   : > { %v576_v21 = vpop.f32.mrf.mxu1  ;;  %v548_v23 = vpop.f32.mrf.mxu0 }
  0xbe   : > { %2063 = vmatpush.xpose.msk.msra.mxu3 %vm607_vm1, %v576_v21 }
  0xc2   : > { %2064 = vmatpush.xpose.msk.msra.mxu3 %vm607_vm1, %v573_v20 }
  0xc5   : > { %2065 = vmatmul.msk.f32.vlgmr.msra.gmra.mxu3 %vm607_vm1, %v545_v22  ;;  %v604_v55 = vpop.f32.mrf.mxu2  ;;  %v718_v11 = vpop.f32.mrf.mxu1 }
  0xc6   : > { %685 = vmatpush.msrb.mxu0 %v604_v55  ;;  %769 = vmatpush.msrb.mxu3 %v2084_v1 }
  0xc8   : > { %686 = vmatpush.msrb.mxu0 %v601_v51  ;;  %770 = vmatpush.msrb.mxu3 %v2083_v2 }
  0xca   : > { %771 = vmatpush.msrb.mxu3 %v2082_v3 }
  0xcc   : > { %772 = vmatpush.msrb.mxu3 %v2081_v4 }
  0xcd   : > { %2066 = vmatmul.msk.f32.gmra.mxu3 %vm607_vm1, %v548_v23  ;;  %v746_v62 = vpop.f32.mrf.mxu2  ;;  %v721_v12 = vpop.f32.mrf.mxu1 }
  0xce   : > { %918 = vmatpush.msra.mxu3 %v695_v8 }
  0xd0   : > { %919 = vmatpush.msra.mxu3 %v694_v13 }
  0xd5   : > { %v749_v63 = vpop.f32.mrf.mxu2  ;;  %2085 = vmatmul.msk.f32.vlgmr.msrb.gmra.mxu3 %vm521_vm0, %v2526_v16 }
  0xd6   : > { %2087 = vmatpush.xpose.msk.msra.mxu0 %vm607_vm1, %v749_v63 }
  0xda   : > { %2088 = vmatpush.xpose.msk.msra.mxu0 %vm607_vm1, %v746_v62 }
  0xdd   : > { %2086 = vmatmul.msk.f32.gmra.mxu3 %vm521_vm0, %v2532_v19 }
 0x148   : > { %v637_v38 = vpop.f32.mrf.mxu3 }
 0x149   : > { %v638_v39 = vadd.f32 %v637_v38, %v2578_v37 }
 0x14b   : > { %v643_v41 = vsel %vm607_vm1, %v638_v39, -inf }
 0x14c   : > { %644 = vmax.xlane.f32.xlu0 %v643_v41 }
 0x150   : > { %v640_v43 = vpop.f32.mrf.mxu3 }
 0x151   : > { %v641_v44 = vadd.f32 %v640_v43, %v2584_v42 }
 0x153   : > { %v646_v45 = vsel %vm607_vm1, %v641_v44, -inf }
 0x154   : > { %647 = vmax.xlane.f32.xlu0 %v646_v45  ;;  %v2093_v45 = vld [vmem:[%s3067_s5 + $0x10] sm:$0xff] }
 0x155   : > { %890 = vmatpush.msra.mxu2 %v2093_v45 }
 0x158   : > { %v774_v15 = vpop.f32.mrf.mxu3 }
 0x160   : > { %v777_v18 = vpop.f32.mrf.mxu3 }
 0x161   : > { %857 = vmatpush.msra.mxu1 %v777_v18  ;;  %v1001_v18 = vld [vmem:[%s3070_s8 + $0x30] sm:$0xff] }
 0x163   : > { %858 = vmatpush.msra.mxu1 %v774_v15 }
 0x1bf   : > { %v645_v50 = vpop.xlane.xlu0 %644 }
 0x1c0   : > { %v649_v52 = vsub.f32 %v638_v39, %v645_v50 }
 0x1c2   : > { %v651_v53 = vmul.f32 1.442695, %v649_v52 }
 0x1c4   : > { %2254 = vpow2.f32 %v651_v53 }
 0x1c7   : > { %v648_v54 = vpop.xlane.xlu0 %647 }
 0x1c8   : > { %v650_v56 = vsub.f32 %v641_v44, %v648_v54 }
 0x1ca   : > { %v2255_v57 = vpop.eup %2254  ;;  %v653_v58 = vmul.f32 1.442695, %v650_v56 }
 0x1cb   : > { %v655_v59 = vsel %vm607_vm1, %v2255_v57, 0.0 }
 0x1cc   : > { %2256 = vpow2.f32 %v653_v58  ;;  %656 = vadd.xlane.f32.xlu1 %v655_v59  ;;  %v2379_v58 = vmov 32.0  }
 0x1d2   : > { %v2257_v60 = vpop.eup %2256 }
 0x1d3   : > { %v658_v61 = vsel %vm607_vm1, %v2257_v60, 0.0 }
 0x1d4   : > { %659 = vadd.xlane.f32.xlu1 %v658_v61 }
 0x23f   : > { %v657_v0 = vpop.xlane.xlu1 %656 }
 0x240   : > { %2258 = vrcp.f32 %v657_v0 }
 0x246   : > { %v2259_v5 = vpop.eup %2258 }
 0x247   : > { %v660_v6 = vpop.xlane.xlu1 %659  ;;  %v663_v7 = vmul.f32 %v2259_v5, %v2255_v57 }
 0x248   : > { %2260 = vrcp.f32 %v660_v6 }
 0x249   : > { %2067 = vmatmul.msk.f32.vlgmr.msrb.gmra.mxu0 %vm607_vm1, %v663_v7 }
 0x24e   : > { %v2261_v9 = vpop.eup %2260 }
 0x24f   : > { %v664_v10 = vmul.f32 %v2261_v9, %v2257_v60  ;;  %v993_v9 = vld [vmem:[%s3069_s7 + $0x18] sm:$0xff] }
 0x250   : > { %1023 = vmatpush.msrb.mxu0 %v993_v9 }
 0x251   : > { %2068 = vmatmul.msk.f32.gmra.mxu0 %vm607_vm1, %v664_v10  ;;  %v992_v10 = vld [vmem:[%s3069_s7 + $0x10] sm:$0xff] }
 0x252   : > { %1024 = vmatpush.msrb.mxu0 %v992_v10 }
 0x259   : > { %2089 = vmatmul.msk.f32.vlgmr.msra.gmra.mxu0 %vm607_vm1, %v718_v11  ;;  %v991_v11 = vld [vmem:[%s3069_s7 + $0x8] sm:$0xff] }
 0x25a   : > { %1025 = vmatpush.msrb.mxu0 %v991_v11 }
 0x261   : > { %2090 = vmatmul.msk.f32.gmra.mxu0 %vm607_vm1, %v721_v12  ;;  %v990_v12 = vld [vmem:[%s3069_s7] sm:$0xff] }
 0x262   : > { %1026 = vmatpush.msrb.mxu0 %v990_v12 }
 0x2c6   : > { %v688_v14 = vpop.f32.mrf.mxu0 }
 0x2c7   : > { %2097 = vmatmul.msk.f32.vlgmr.msra.gmra.mxu3 %vm607_vm1, %v688_v14 }
 0x2ce   : > { %v691_v17 = vpop.f32.mrf.mxu0 }
 0x2cf   : > { %2098 = vmatmul.msk.f32.gmra.mxu3 %vm607_vm1, %v691_v17  ;;  %v1002_v17 = vld [vmem:[%s3070_s8 + $0x38] sm:$0xff] }
 0x2d0   : > { %1052 = vmatpush.msrb.mxu1 %v1002_v17  ;;  %v2122_v17 = vld [vmem:[%s3066_s4 + $0x158] sm:$0xff] }
 0x2d1   : > { %1207 = vmatpush.msra.mxu0 %v2122_v17 }
 0x2d2   : > { %1053 = vmatpush.msrb.mxu1 %v1001_v18  ;;  %v2109_v18 = vld [vmem:[%s3066_s4 + $0xd0] sm:$0xff] }
 0x2d6   : > { %v809_v20 = vpop.f32.mrf.mxu0 }
 0x2d7   : > { %v810_v21 = vadd.f32 %v809_v20, %v2578_v37  ;;  %v1000_v20 = vld [vmem:[%s3070_s8 + $0x28] sm:$0xff] }
 0x2d8   : > { %1054 = vmatpush.msrb.mxu1 %v1000_v20  ;;  %v2115_v20 = vld [vmem:[%s3066_s4 + $0x110] sm:$0xff] }
 0x2d9   : > { %v815_v22 = vsel %vm607_vm1, %v810_v21, -inf }
 0x2da   : > { %816 = vmax.xlane.f32.xlu2 %v815_v22 }
 0x2de   : > { %v812_v23 = vpop.f32.mrf.mxu0 }
 0x2df   : > { %v813_v24 = vadd.f32 %v812_v23, %v2584_v42  ;;  %v999_v23 = vld [vmem:[%s3070_s8 + $0x20] sm:$0xff] }
 0x2e0   : > { %1055 = vmatpush.msrb.mxu1 %v999_v23  ;;  %v2114_v23 = vld [vmem:[%s3066_s4 + $0x108] sm:$0xff] }
 0x2e1   : > { %v818_v25 = vsel %vm607_vm1, %v813_v24, -inf }
 0x2e2   : > { %819 = vmax.xlane.f32.xlu2 %v818_v25 }
 0x34a   : > { %v921_v48 = vpop.f32.mrf.mxu3 }
 0x34d   : > { %v817_v26 = vpop.xlane.xlu2 %816 }
 0x34e   : > { %v821_v27 = vsub.f32 %v810_v21, %v817_v26  ;;  %v998_v26 = vld [vmem:[%s3070_s8 + $0x18] sm:$0xff] }
 0x34f   : > { %1056 = vmatpush.msrb.mxu1 %v998_v26  ;;  %v2113_v26 = vld [vmem:[%s3066_s4 + $0x100] sm:$0xff] }
 0x350   : > { %v823_v28 = vmul.f32 1.442695, %v821_v27 }
 0x352   : > { %2262 = vpow2.f32 %v823_v28  ;;  %v924_v53 = vpop.f32.mrf.mxu3 }
 0x355   : > { %v820_v29 = vpop.xlane.xlu2 %819 }
 0x356   : > { %v822_v30 = vsub.f32 %v813_v24, %v820_v29 }
 0x358   : > { %v2263_v31 = vpop.eup %2262  ;;  %v825_v32 = vmul.f32 1.442695, %v822_v30 }
 0x359   : > { %v827_v33 = vsel %vm607_vm1, %v2263_v31, 0.0 }
 0x35a   : > { %2264 = vpow2.f32 %v825_v32  ;;  %828 = vadd.xlane.f32.xlu0 %v827_v33 }
 0x360   : > { %v2265_v34 = vpop.eup %2264 }
 0x361   : > { %v830_v35 = vsel %vm607_vm1, %v2265_v34, 0.0 }
 0x362   : > { %831 = vadd.xlane.f32.xlu1 %v830_v35 }
 0x3cd   : > { %v829_v38 = vpop.xlane.xlu0 %828 }
 0x3ce   : > { %2266 = vrcp.f32 %v829_v38 }
 0x3d4   : > { %v2267_v39 = vpop.eup %2266 }
 0x3d5   : > { %v835_v40 = vmul.f32 %v2267_v39, %v2263_v31  ;;  %v832_v41 = vpop.xlane.xlu1 %831  ;;  %v2237_v39 = vld [vmem:[%s3068_s6 + $0x1] ss:$0 sm:$0xff] }
 0x3d6   : > { %2268 = vrcp.f32 %v832_v41 }
 0x3d7   : > { %2091 = vmatmul.msk.f32.vlgmr.msra.gmra.mxu1 %vm607_vm1, %v835_v40  ;;  %2270 = vrcp.f32 %v2379_v58 }
 0x3dc   : > { %v2269_v43 = vpop.eup %2268 }
 0x3dd   : > { %v836_v44 = vmul.f32 %v2269_v43, %v2265_v34  ;;  %v2271_v59 = vpop.eup %2270  ;;  %v2236_v34 = vld [vmem:[%s3068_s6] ss:$0 sm:$0xff] }
 0x3de   : > { %v936_v60 = vmul.f32 32.0, %v2271_v59  ;;  %vm940_vm6 = vweird.f32 %v2271_v59 }
 0x3df   : > { %2092 = vmatmul.msk.f32.gmra.mxu1 %vm607_vm1, %v836_v44 }
 0x3e0   : > { %v937_v61 = vsub.f32 1.0, %v936_v60  ;;  %v2239_v60 = vld [vmem:[%s3070_s8 + $0x40] ss:$0 sm:$0xff] }
 0x3e2   : > { %v938_v62 = vmul.f32 %v2271_v59, %v937_v61 }
 0x3e4   : > { %v939_v63 = vadd.f32 %v2271_v59, %v938_v62 }
 0x454   : > { %v860_v46 = vpop.f32.mrf.mxu1 }
 0x455   : > { %2095 = vmatmul.msk.f32.vlgmr.msra.gmra.mxu2 %vm607_vm1, %v860_v46 }
 0x45c   : > { %v863_v47 = vpop.f32.mrf.mxu1 }
 0x45d   : > { %2096 = vmatmul.msk.f32.gmra.mxu2 %vm607_vm1, %v863_v47 }
 0x4d8   : > { %v892_v49 = vpop.f32.mrf.mxu2 }
 0x4d9   : > { %v922_v50 = vadd.f32 %v921_v48, %v892_v49 }
 0x4db   : > { %v927_v51 = vadd.f32 %v922_v50, %v2526_v16  ;;  %v2658_v16 = vsel %vm940_vm6, %v2271_v59, %v939_v63  ;;  %v997_v50 = vld [vmem:[%s3070_s8 + $0x10] sm:$0xff] }
 0x4dc   : > { %1057 = vmatpush.msrb.mxu1 %v997_v50 }
 0x4dd   : > { %v929_v52 = vsel %vm521_vm0, %v927_v51, 0.0 }
 0x4de   : > { %930 = vadd.xlane.f32.xlu2 %v929_v52  ;;  %v995_v52 = vld [vmem:[%s3070_s8] sm:$0xff] }
 0x4e0   : > { %v895_v54 = vpop.f32.mrf.mxu2 }
 0x4e1   : > { %v925_v55 = vadd.f32 %v924_v53, %v895_v54  ;;  %v2238_v53 = vld [vmem:[%s3069_s7 + $0x20] ss:$0 sm:$0xff] }
 0x4e3   : > { %v928_v56 = vadd.f32 %v925_v55, %v2532_v19 }
 0x4e5   : > { %v932_v57 = vsel %vm521_vm0, %v928_v56, 0.0 }
 0x4e6   : > { %933 = vadd.xlane.f32.xlu0 %v932_v57 }
 0x551   : > { %v931_v0 = vpop.xlane.xlu2 %930 }
 0x552   : > { %v942_v1 = vmul.f32 %v2658_v16, %v931_v0 }
 0x554   : > { %v944_v2 = vsub.f32 %v927_v51, %v942_v1  ;;  %v996_v51 = vld [vmem:[%s3070_s8 + $0x8] sm:$0xff] }
 0x555   : > { %1058 = vmatpush.msrb.mxu1 %v996_v51 }
 0x556   : > { %v946_v3 = vmul.f32 %v944_v2, %v944_v2 }
 0x557   : > { %1059 = vmatpush.msrb.mxu1 %v995_v52  ;;  %v2240_v52 = vld [vmem:[%s3068_s6 + $0x2] ss:$0 sm:$0xff] }
 0x558   : > { %v948_v19 = vsel %vm521_vm0, %v946_v3, 0.0 }
 0x559   : > { %v934_v4 = vpop.xlane.xlu0 %933  ;;  %949 = vadd.xlane.f32.xlu1 %v948_v19 }
 0x55a   : > { %v943_v5 = vmul.f32 %v2658_v16, %v934_v4 }
 0x55c   : > { %v945_v6 = vsub.f32 %v928_v56, %v943_v5 }
 0x55e   : > { %v947_v7 = vmul.f32 %v945_v6, %v945_v6 }
 0x560   : > { %v951_v8 = vsel %vm521_vm0, %v947_v7, 0.0 }
 0x561   : > { %952 = vadd.xlane.f32.xlu2 %v951_v8 }
 0x5cc   : > { %v950_v13 = vpop.xlane.xlu1 %949 }
 0x5cd   : > { %v954_v14 = vmul.f32 %v950_v13, %v2658_v16 }
 0x5cf   : > { %v956_v15 = vadd.f32 1e-05, %v954_v14  ;;  %v2110_v14 = vld [vmem:[%s3066_s4 + $0xd8] sm:$0xff] }
 0x5d0   : > { %1151 = vmatpush.msrb.mxu2 %v2110_v14 }
 0x5d1   : > { %2272 = vrsqrt.f32 %v956_v15  ;;  %vm964_vm8 = vweird.f32 %v956_v15 }
 0x5d2   : > { %1152 = vmatpush.msrb.mxu2 %v2109_v18 }
 0x5d4   : > { %v953_v21 = vpop.xlane.xlu2 %952 }
 0x5d5   : > { %v955_v22 = vmul.f32 %v953_v21, %v2658_v16  ;;  %v2121_v21 = vld [vmem:[%s3066_s4 + $0x150] sm:$0xff] }
 0x5d6   : > { %1208 = vmatpush.msra.mxu0 %v2121_v21 }
 0x5d7   : > { %v2273_v24 = vpop.eup %2272  ;;  %v957_v25 = vadd.f32 1e-05, %v955_v22  ;;  %v2108_v22 = vld [vmem:[%s3066_s4 + $0xc8] sm:$0xff] }
 0x5d8   : > { %v959_v27 = vmul.f32 %v2273_v24, %v956_v15  ;;  %vm965_vm7 = vweird.f32 %v2273_v24  ;;  %v2116_v15 = vld [vmem:[%s3066_s4 + $0x118] sm:$0xff]  ;;  %1153 = vmatpush.msrb.mxu2 %v2108_v22 }
 0x5d9   : > { %2274 = vrsqrt.f32 %v957_v25  ;;  %vm966_vm9 = vmor %vm964_vm8, %vm965_vm7  ;;  %vm974_vm11 = vweird.f32 %v957_v25  ;;  %1179 = vmatpush.msrb.mxu3 %v2116_v15 }
 0x5da   : > { %v960_v28 = vmul.f32 %v2273_v24, %v959_v27  ;;  %v2119_v27 = vld [vmem:[%s3066_s4 + $0x140] sm:$0xff] }
 0x5db   : > { %1180 = vmatpush.msrb.mxu3 %v2115_v20 }
 0x5dc   : > { %v961_v29 = vmul.f32 0.5, %v960_v28 }
 0x5dd   : > { %1181 = vmatpush.msrb.mxu3 %v2114_v23 }
 0x5de   : > { %v962_v30 = vsub.f32 1.5, %v961_v29 }
 0x5df   : > { %v2275_v31 = vpop.eup %2274  ;;  %1182 = vmatpush.msrb.mxu3 %v2113_v26 }
 0x5e0   : > { %v963_v32 = vmul.f32 %v2273_v24, %v962_v30  ;;  %v969_v33 = vmul.f32 %v2275_v31, %v957_v25  ;;  %vm975_vm10 = vweird.f32 %v2275_v31  ;;  %v2107_v25 = vld [vmem:[%s3066_s4 + $0xc0] sm:$0xff] }
 0x5e1   : > { %vm976_vm12 = vmor %vm974_vm11, %vm975_vm10  ;;  %1154 = vmatpush.msrb.mxu2 %v2107_v25 }
 0x5e2   : > { %v967_v35 = vsel %vm966_vm9, %v2273_v24, %v963_v32  ;;  %v970_v36 = vmul.f32 %v2275_v31, %v969_v33  ;;  %v2120_v24 = vld [vmem:[%s3066_s4 + $0x148] sm:$0xff]  ;;  %v2142_v32 = vld [vmem:[%s3066_s4 + $0x138] sm:$0xff]  ;;  %v2135_v33 = vld [vmem:[%s3066_s4 + $0xf0] sm:$0xff] }
 0x5e3   : > { %v978_v38 = vmul.f32 %v967_v35, %v944_v2  ;;  %1209 = vmatpush.msra.mxu0 %v2120_v24 }
 0x5e4   : > { %v971_v40 = vmul.f32 0.5, %v970_v36  ;;  %v2134_v36 = vld [vmem:[%s3066_s4 + $0xe8] sm:$0xff] }
 0x5e5   : > { %v983_v41 = vmul.f32 %v2236_v34, %v978_v38  ;;  %1210 = vmatpush.msra.mxu0 %v2119_v27  ;;  %v2140_v38 = vld [vmem:[%s3066_s4 + $0x128] sm:$0xff] }
 0x5e6   : > { %v972_v43 = vsub.f32 1.5, %v971_v40  ;;  %v2133_v40 = vld [vmem:[%s3066_s4 + $0xe0] sm:$0xff] }
 0x5e7   : > { %v988_v44 = vadd.f32 %v2237_v39, %v983_v41  ;;  %v2139_v41 = vld [vmem:[%s3066_s4 + $0x120] sm:$0xff] }
 0x5e8   : > { %v973_v45 = vmul.f32 %v2275_v31, %v972_v43 }
 0x5e9   : > { %2099 = vmatmul.msk.f32.vlgmr.msrb.gmra.mxu0 %vm521_vm0, %v988_v44 }
 0x5ea   : > { %v977_v46 = vsel %vm976_vm12, %v2275_v31, %v973_v45  ;;  %v2136_v31 = vld [vmem:[%s3066_s4 + $0xf8] sm:$0xff]  ;;  %1352 = vmatpush.msrb.mxu0 %v2142_v32  ;;  %vm1808_vm12 = vcmask 1045504  }
 0x5eb   : > { %v979_v47 = vmul.f32 %v977_v46, %v945_v6  ;;  %1324 = vmatpush.msra.mxu3 %v2136_v31 }
 0x5ed   : > { %v984_v48 = vmul.f32 %v2236_v34, %v979_v47  ;;  %v2141_v34 = vld [vmem:[%s3066_s4 + $0x130] sm:$0xff]  ;;  %1325 = vmatpush.msra.mxu3 %v2135_v33 }
 0x5ee   : > { %1353 = vmatpush.msrb.mxu0 %v2141_v34  ;;  %v2132_v34 = vld [vmem:[%s3067_s5 + $0x28] sm:$0xff] }
 0x5ef   : > { %v989_v49 = vadd.f32 %v2237_v39, %v984_v48  ;;  %1326 = vmatpush.msra.mxu3 %v2134_v36 }
 0x5f0   : > { %1354 = vmatpush.msrb.mxu0 %v2140_v38 }
 0x5f1   : > { %2100 = vmatmul.msk.f32.gmra.mxu0 %vm521_vm0, %v989_v49  ;;  %1327 = vmatpush.msra.mxu3 %v2133_v40 }
 0x5f2   : > { %1355 = vmatpush.msrb.mxu0 %v2139_v41 }
 0x666   : > { %v1028_v54 = vpop.f32.mrf.mxu0 }
 0x667   : > { %v1029_v55 = vadd.f32 %v2238_v53, %v1028_v54 }
 0x669   : > { %v1034_v56 = vmax.f32 %v1029_v55, 0.0  ;;  %v2241_v55 = vld [vmem:[%s3068_s6 + $0x3] ss:$0 sm:$0xff] }
 0x66b   : > { %2101 = vmatmul.msk.f32.vlgmr.msrb.gmra.mxu1 %vm1037_vm13, %v1034_v56 }
 0x66e   : > { %v1031_v57 = vpop.f32.mrf.mxu0 }
 0x66f   : > { %v1032_v58 = vadd.f32 %v2238_v53, %v1031_v57 }
 0x671   : > { %v1035_v59 = vmax.f32 %v1032_v58, 0.0 }
 0x673   : > { %2102 = vmatmul.msk.f32.gmra.mxu1 %vm1037_vm13, %v1035_v59 }
 0x6e8   : > { %v1061_v61 = vpop.f32.mrf.mxu1 }
 0x6e9   : > { %v1062_v62 = vadd.f32 %v2239_v60, %v1061_v61 }
 0x6eb   : > { %v1067_v63 = vadd.f32 %v1062_v62, %v988_v44 }
 0x6ed   : > { %v1069_v0 = vsel %vm521_vm0, %v1067_v63, 0.0 }
 0x6ee   : > { %1070 = vadd.xlane.f32.xlu0 %v1069_v0 }
 0x6f0   : > { %v1064_v1 = vpop.f32.mrf.mxu1 }
 0x6f1   : > { %v1065_v2 = vadd.f32 %v2239_v60, %v1064_v1 }
 0x6f3   : > { %v1068_v3 = vadd.f32 %v1065_v2, %v989_v49 }
 0x6f5   : > { %v1072_v19 = vsel %vm521_vm0, %v1068_v3, 0.0 }
 0x6f6   : > { %1073 = vadd.xlane.f32.xlu1 %v1072_v19 }
 0x761   : > { %v1071_v4 = vpop.xlane.xlu0 %1070 }
 0x762   : > { %v1075_v5 = vmul.f32 %v1071_v4, %v2658_v16 }
 0x764   : > { %v2721_v6 = vsub.f32 %v1067_v63, %v1075_v5 }
 0x766   : > { %v1079_v7 = vmul.f32 %v2721_v6, %v2721_v6 }
 0x768   : > { %v1081_v8 = vsel %vm521_vm0, %v1079_v7, 0.0 }
 0x769   : > { %1082 = vadd.xlane.f32.xlu2 %v1081_v8  ;;  %v1074_v9 = vpop.xlane.xlu1 %1073  ;;  %v2147_v8 = vld [vmem:[%s3066_s4 + $0x170] sm:$0xff] }
 0x76a   : > { %v1076_v10 = vmul.f32 %v1074_v9, %v2658_v16  ;;  %v2146_v9 = vld [vmem:[%s3066_s4 + $0x168] sm:$0xff] }
 0x76c   : > { %v2727_v11 = vsub.f32 %v1068_v3, %v1076_v10  ;;  %v2145_v10 = vld [vmem:[%s3066_s4 + $0x160] sm:$0xff] }
 0x76e   : > { %v1080_v12 = vmul.f32 %v2727_v11, %v2727_v11 }
 0x770   : > { %v1084_v13 = vsel %vm521_vm0, %v1080_v12, 0.0 }
 0x771   : > { %1085 = vadd.xlane.f32.xlu0 %v1084_v13 }
 0x7dc   : > { %v1083_v28 = vpop.xlane.xlu2 %1082 }
 0x7dd   : > { %v1087_v29 = vmul.f32 %v1083_v28, %v2658_v16 }
 0x7df   : > { %v1089_v30 = vadd.f32 1e-05, %v1087_v29 }
 0x7e1   : > { %2276 = vrsqrt.f32 %v1089_v30  ;;  %vm1097_vm15 = vweird.f32 %v1089_v30 }
 0x7e4   : > { %v1086_v35 = vpop.xlane.xlu0 %1085 }
 0x7e5   : > { %v1088_v39 = vmul.f32 %v1086_v35, %v2658_v16 }
 0x7e7   : > { %v2277_v43 = vpop.eup %2276  ;;  %v1090_v44 = vadd.f32 1e-05, %v1088_v39 }
 0x7e8   : > { %v1092_v45 = vmul.f32 %v2277_v43, %v1089_v30  ;;  %vm1098_vm14 = vweird.f32 %v2277_v43 }
 0x7e9   : > { %2278 = vrsqrt.f32 %v1090_v44  ;;  %vm1099_vm2 = vmor %vm1097_vm15, %vm1098_vm14  ;;  %vm1107_vm4 = vweird.f32 %v1090_v44 }
 0x7ea   : > { %v1093_v46 = vmul.f32 %v2277_v43, %v1092_v45 }
 0x7ec   : > { %v1094_v47 = vmul.f32 0.5, %v1093_v46 }
 0x7ee   : > { %v1095_v48 = vsub.f32 1.5, %v1094_v47 }
 0x7ef   : > { %v2279_v49 = vpop.eup %2278 }
 0x7f0   : > { %v1096_v50 = vmul.f32 %v2277_v43, %v1095_v48  ;;  %v1102_v51 = vmul.f32 %v2279_v49, %v1090_v44  ;;  %vm1108_vm3 = vweird.f32 %v2279_v49  ;;  %v2131_v44 = vld [vmem:[%s3067_s5 + $0x20] sm:$0xff] }
 0x7f1   : > { %vm1109_vm5 = vmor %vm1107_vm4, %vm1108_vm3  ;;  %vm1804_vm4 = vcmask 48128  }
 0x7f2   : > { %v1100_v53 = vsel %vm1099_vm2, %v2277_v43, %v1096_v50  ;;  %v1103_v54 = vmul.f32 %v2279_v49, %v1102_v51 }
 0x7f3   : > { %v1111_v56 = vmul.f32 %v1100_v53, %v2721_v6  ;;  %v2148_v6 = vld [vmem:[%s3066_s4 + $0x178] sm:$0xff] }
 0x7f4   : > { %v1104_v57 = vmul.f32 0.5, %v1103_v54 }
 0x7f5   : > { %v1116_v58 = vmul.f32 %v2240_v52, %v1111_v56 }
 0x7f6   : > { %v1105_v59 = vsub.f32 1.5, %v1104_v57 }
 0x7f7   : > { %v2801_v60 = vadd.f32 %v2241_v55, %v1116_v58 }
 0x7f8   : > { %v1106_v61 = vmul.f32 %v2279_v49, %v1105_v59 }
 0x7f9   : > { %2111 = vmatmul.msk.f32.vlgmr.msrb.gmra.mxu2 %vm521_vm0, %v2801_v60  ;;  %2117 = vmatmul.msk.f32.vlgmr.msrb.gmra.mxu3 %vm521_vm0, %v2801_v60 }
 0x7fa   : > { %v1110_v62 = vsel %vm1109_vm5, %v2279_v49, %v1106_v61  ;;  %2123 = vmatmul.msk.f32.vlgmr.msra.gmra.mxu0 %vm521_vm0, %v2801_v60 }
 0x7fb   : > { %v1112_v63 = vmul.f32 %v1110_v62, %v2727_v11 }
 0x7fd   : > { %v1117_v0 = vmul.f32 %v2240_v52, %v1112_v63 }
 0x7ff   : > { %v2810_v1 = vadd.f32 %v2241_v55, %v1117_v0 }
 0x801   : > { %2112 = vmatmul.msk.f32.gmra.mxu2 %vm521_vm0, %v2810_v1  ;;  %2118 = vmatmul.msk.f32.gmra.mxu3 %vm521_vm0, %v2810_v1 }
 0x802   : > { %2124 = vmatmul.msk.f32.gmra.mxu0 %vm521_vm0, %v2810_v1 }
 0x809   : > { %2137 = vmatmul.msk.f32.vlgmr.msra.gmra.mxu3 %vm521_vm0, %v2801_v60 }
 0x80a   : > { %2143 = vmatmul.msk.f32.vlgmr.msrb.gmra.mxu0 %vm521_vm0, %v2801_v60 }
 0x811   : > { %2138 = vmatmul.msk.f32.gmra.mxu3 %vm521_vm0, %v2810_v1 }
 0x812   : > { %2144 = vmatmul.msk.f32.gmra.mxu0 %vm521_vm0, %v2810_v1 }
 0x877   : > { %v1212_v2 = vpop.f32.mrf.mxu0 }
 0x87c   : > { %v1184_v3 = vpop.f32.mrf.mxu3  ;;  %v1156_v7 = vpop.f32.mrf.mxu2 }
 0x87f   : > { %v1215_v19 = vpop.f32.mrf.mxu0 }
 0x880   : > { %1295 = vmatpush.msra.mxu2 %v1215_v19 }
 0x882   : > { %1296 = vmatpush.msra.mxu2 %v1212_v2 }
 0x884   : > { %v1187_v4 = vpop.f32.mrf.mxu3  ;;  %v1159_v12 = vpop.f32.mrf.mxu2 }
 0x885   : > { %2125 = vmatpush.xpose.msk.msra.mxu1 %vm607_vm1, %v1187_v4 }
 0x887   : > { %v1357_v5 = vpop.f32.mrf.mxu0 }
 0x889   : > { %2126 = vmatpush.xpose.msk.msra.mxu1 %vm607_vm1, %v1184_v3 }
 0x88c   : > { %2127 = vmatmul.msk.f32.vlgmr.msra.gmra.mxu1 %vm607_vm1, %v1156_v7  ;;  %v1329_v41 = vpop.f32.mrf.mxu3 }
 0x88d   : > { %1380 = vmatpush.msrb.mxu1 %v2148_v6 }
 0x88f   : > { %1381 = vmatpush.msrb.mxu1 %v2147_v8  ;;  %v1360_v11 = vpop.f32.mrf.mxu0  ;;  %v2889_v8 = vld [vmem:[%s3065_s3] sm:$0x3f] }
 0x890   : > { %2151 = vmatpush.xpose.msk.msrb.mxu2 %vm607_vm1, %v1360_v11 }
 0x891   : > { %1382 = vmatpush.msrb.mxu1 %v2146_v9  ;;  %v1752_v9 = vld [vmem:[%s464_s25] sm:$0x3]  ;;  %s456_s25 = scalar_lea.vmem [#allocation3], %s2045_s26  ;;  %s2334_s26 = scalar_lea.hbm %s3073_s11, 4 }
 0x892   : > { %s1948_s29 = sshll.u32 %s456_s25, 4  ;;  %p2336_p4 = scmp.lt.s32.totalorder %s2334_s26, %s2330_s14  ;;  %s1949_s29 = int_to_ptr.vmem [resolvable:$true] %s1948_s29 }
 0x893   : > { %1383 = vmatpush.msrb.mxu1 %v2145_v10 }
 0x894   : > { %2152 = vmatpush.xpose.msk.msrb.mxu2 %vm607_vm1, %v1357_v5  ;;  %2128 = vmatmul.msk.f32.gmra.mxu1 %vm607_vm1, %v1159_v12  ;;  %v1332_v43 = vpop.f32.mrf.mxu3  ;;  %v2157_v5 = vld [vmem:[%s3067_s5 + $0x30] sm:$0xff]  ;;  %p2337_p5 = por %p2336_p4, %p2335_p3 }
 0x895   : > { %1529 = vmatpush.msra.mxu1 %v2132_v34  ;;  %v2164_v34 = vld [vmem:[%s3069_s7 + $0x30] sm:$0xff] }
 0x896   : > { %p2338_p7 = pnand %p2337_p5, %p2333_p2 }
 0x897   : > { %1530 = vmatpush.msra.mxu1 %v2131_v44 }
 0x89c   : > { %2149 = vmatmul.msk.f32.vlgmr.msrb.gmra.mxu1 %vm521_vm0, %v2801_v60 }
 0x89d   : > { %2183 = vmatpush.msk.msrb.mxu1 %vm1808_vm12, %v2889_v8 }
 0x8a4   : > { %2150 = vmatmul.msk.f32.gmra.mxu1 %vm521_vm0, %v2810_v1 }
 0x909   : > { %v1247_v13 = vpop.f32.mrf.mxu1 }
 0x90a   : > { %v1248_v14 = vadd.f32 %v1247_v13, %v2578_v37 }
 0x90c   : > { %v1253_v15 = vsel %vm607_vm1, %v1248_v14, -inf }
 0x90d   : > { %1254 = vmax.xlane.f32.xlu1 %v1253_v15 }
 0x911   : > { %v1250_v17 = vpop.f32.mrf.mxu1 }
 0x912   : > { %v1251_v18 = vadd.f32 %v1250_v17, %v2584_v42 }
 0x914   : > { %v1256_v20 = vsel %vm607_vm1, %v1251_v18, -inf }
 0x915   : > { %1257 = vmax.xlane.f32.xlu2 %v1256_v20 }
 0x919   : > { %v1385_v21 = vpop.f32.mrf.mxu1 }
 0x921   : > { %v1388_v22 = vpop.f32.mrf.mxu1 }
 0x922   : > { %1468 = vmatpush.msrb.mxu3 %v1388_v22 }
 0x924   : > { %1469 = vmatpush.msrb.mxu3 %v1385_v21 }
 0x980   : > { %v1255_v23 = vpop.xlane.xlu1 %1254 }
 0x981   : > { %v1259_v24 = vsub.f32 %v1248_v14, %v1255_v23 }
 0x983   : > { %v1261_v25 = vmul.f32 1.442695, %v1259_v24 }
 0x985   : > { %2280 = vpow2.f32 %v1261_v25 }
 0x988   : > { %v1258_v26 = vpop.xlane.xlu2 %1257 }
 0x989   : > { %v1260_v27 = vsub.f32 %v1251_v18, %v1258_v26 }
 0x98b   : > { %v2281_v28 = vpop.eup %2280  ;;  %v1263_v29 = vmul.f32 1.442695, %v1260_v27 }
 0x98c   : > { %v1265_v30 = vsel %vm607_vm1, %v2281_v28, 0.0 }
 0x98d   : > { %2282 = vpow2.f32 %v1263_v29  ;;  %1266 = vadd.xlane.f32.xlu0 %v1265_v30 }
 0x993   : > { %v2283_v31 = vpop.eup %2282 }
 0x994   : > { %v1268_v32 = vsel %vm607_vm1, %v2283_v31, 0.0 }
 0x995   : > { %1269 = vadd.xlane.f32.xlu1 %v1268_v32  ;;  %v2166_v32 = vld [vmem:[%s3069_s7 + $0x40] sm:$0xff] }
 0xa00   : > { %v1267_v33 = vpop.xlane.xlu0 %1266 }
 0xa01   : > { %2284 = vrcp.f32 %v1267_v33  ;;  %v2165_v33 = vld [vmem:[%s3069_s7 + $0x38] sm:$0xff] }
 0xa07   : > { %v2285_v35 = vpop.eup %2284 }
 0xa08   : > { %v1273_v36 = vmul.f32 %v2285_v35, %v2281_v28  ;;  %v1270_v38 = vpop.xlane.xlu1 %1269  ;;  %v2163_v35 = vld [vmem:[%s3069_s7 + $0x28] sm:$0xff] }
 0xa09   : > { %2286 = vrcp.f32 %v1270_v38 }
 0xa0a   : > { %2129 = vmatmul.msk.f32.vlgmr.msra.gmra.mxu2 %vm607_vm1, %v1273_v36 }
 0xa0b   : > { %1629 = vmatpush.msra.mxu2 %v2166_v32 }
 0xa0d   : > { %1630 = vmatpush.msra.mxu2 %v2165_v33  ;;  %v1838_v33 = vld [vmem:[%s3071_s9 + $0x38] sm:$0xff] }
 0xa0f   : > { %v2287_v39 = vpop.eup %2286  ;;  %1631 = vmatpush.msra.mxu2 %v2164_v34  ;;  %v1837_v34 = vld [vmem:[%s3071_s9 + $0x30] sm:$0xff] }
 0xa10   : > { %v1274_v40 = vmul.f32 %v2287_v39, %v2283_v31 }
 0xa11   : > { %1632 = vmatpush.msra.mxu2 %v2163_v35  ;;  %v1836_v35 = vld [vmem:[%s3071_s9 + $0x28] sm:$0xff] }
 0xa12   : > { %2130 = vmatmul.msk.f32.gmra.mxu2 %vm607_vm1, %v1274_v40 }
 0xa1a   : > { %2153 = vmatmul.msk.f32.vlgmr.msrb.gmra.mxu2 %vm607_vm1, %v1329_v41  ;;  %v2175_v41 = vld [vmem:[%s3070_s8 + $0x80] sm:$0xff] }
 0xa1b   : > { %1657 = vmatpush.msra.mxu3 %v2175_v41  ;;  %1860 = vmatpush.msrb.mxu2 %v1838_v33 }
 0xa1d   : > { %1861 = vmatpush.msrb.mxu2 %v1837_v34 }
 0xa1f   : > { %1862 = vmatpush.msrb.mxu2 %v1836_v35 }
 0xa22   : > { %2154 = vmatmul.msk.f32.gmra.mxu2 %vm607_vm1, %v1332_v43  ;;  %v2174_v43 = vld [vmem:[%s3070_s8 + $0x78] sm:$0xff] }
 0xa23   : > { %1658 = vmatpush.msra.mxu3 %v2174_v43 }
 0xa8d   : > { %v1298_v45 = vpop.f32.mrf.mxu2 }
 0xa8e   : > { %2161 = vmatmul.msk.f32.vlgmr.msra.gmra.mxu1 %vm607_vm1, %v1298_v45  ;;  %v2173_v45 = vld [vmem:[%s3070_s8 + $0x70] sm:$0xff] }
 0xa8f   : > { %1659 = vmatpush.msra.mxu3 %v2173_v45 }
 0xa95   : > { %v1301_v46 = vpop.f32.mrf.mxu2 }
 0xa96   : > { %2162 = vmatmul.msk.f32.gmra.mxu1 %vm607_vm1, %v1301_v46 }
 0xa9d   : > { %v1420_v47 = vpop.f32.mrf.mxu2 }
 0xa9e   : > { %v1421_v48 = vadd.f32 %v1420_v47, %v2578_v37 }
 0xaa0   : > { %v1426_v49 = vsel %vm607_vm1, %v1421_v48, -inf }
 0xaa1   : > { %1427 = vmax.xlane.f32.xlu2 %v1426_v49  ;;  %v2172_v49 = vld [vmem:[%s3070_s8 + $0x68] sm:$0xff] }
 0xaa2   : > { %1660 = vmatpush.msra.mxu3 %v2172_v49 }
 0xaa5   : > { %v1423_v50 = vpop.f32.mrf.mxu2 }
 0xaa6   : > { %v1424_v51 = vadd.f32 %v1423_v50, %v2584_v42  ;;  %v2158_v42 = vld [vmem:[%s3067_s5 + $0x38] sm:$0xff] }
 0xaa7   : > { %1500 = vmatpush.msra.mxu0 %v2158_v42 }
 0xaa8   : > { %v1429_v52 = vsel %vm607_vm1, %v1424_v51, -inf }
 0xaa9   : > { %1430 = vmax.xlane.f32.xlu0 %v1429_v52  ;;  %1501 = vmatpush.msra.mxu0 %v2157_v5  ;;  %v2171_v52 = vld [vmem:[%s3070_s8 + $0x60] sm:$0xff] }
 0xaaa   : > { %1661 = vmatpush.msra.mxu3 %v2171_v52 }
 0xaab   : > { %2181 = vmatpush.xpose.msk.msrb.mxu0 %vm521_vm0, %v2889_v8 }
 0xb0b   : > { %v1532_v10 = vpop.f32.mrf.mxu1 }
 0xb13   : > { %v1535_v15 = vpop.f32.mrf.mxu1 }
 0xb14   : > { %v1428_v53 = vpop.xlane.xlu2 %1427 }
 0xb15   : > { %v1432_v54 = vsub.f32 %v1421_v48, %v1428_v53 }
 0xb17   : > { %v1434_v55 = vmul.f32 1.442695, %v1432_v54 }
 0xb19   : > { %2288 = vpow2.f32 %v1434_v55 }
 0xb1c   : > { %v1431_v56 = vpop.xlane.xlu0 %1430 }
 0xb1d   : > { %v1433_v57 = vsub.f32 %v1424_v51, %v1431_v56 }
 0xb1f   : > { %v2289_v58 = vpop.eup %2288  ;;  %v1436_v59 = vmul.f32 1.442695, %v1433_v57 }
 0xb20   : > { %v1438_v61 = vsel %vm607_vm1, %v2289_v58, 0.0 }
 0xb21   : > { %2290 = vpow2.f32 %v1436_v59  ;;  %1439 = vadd.xlane.f32.xlu1 %v1438_v61 }
 0xb27   : > { %v2291_v37 = vpop.eup %2290 }
 0xb28   : > { %v1441_v62 = vsel %vm607_vm1, %v2291_v37, 0.0 }
 0xb29   : > { %1442 = vadd.xlane.f32.xlu2 %v1441_v62  ;;  %v2242_v62 = vld [vmem:[%s3068_s6 + $0x4] ss:$0 sm:$0xff] }
 0xb94   : > { %v1440_v63 = vpop.xlane.xlu1 %1439 }
 0xb95   : > { %2292 = vrcp.f32 %v1440_v63 }
 0xb9b   : > { %v2293_v0 = vpop.eup %2292 }
 0xb9c   : > { %v1446_v2 = vmul.f32 %v2293_v0, %v2289_v58  ;;  %v1443_v3 = vpop.xlane.xlu2 %1442 }
 0xb9d   : > { %2294 = vrcp.f32 %v1443_v3 }
 0xb9e   : > { %2155 = vmatmul.msk.f32.vlgmr.msrb.gmra.mxu3 %vm607_vm1, %v1446_v2  ;;  %v2243_v2 = vld [vmem:[%s3068_s6 + $0x5] ss:$0 sm:$0xff] }
 0xba3   : > { %v2295_v19 = vpop.eup %2294 }
 0xba4   : > { %v1447_v4 = vmul.f32 %v2295_v19, %v2291_v37 }
 0xba6   : > { %2156 = vmatmul.msk.f32.gmra.mxu3 %vm607_vm1, %v1447_v4 }
 0xc21   : > { %v1471_v6 = vpop.f32.mrf.mxu3 }
 0xc22   : > { %2159 = vmatmul.msk.f32.vlgmr.msra.gmra.mxu0 %vm607_vm1, %v1471_v6 }
 0xc29   : > { %v1474_v7 = vpop.f32.mrf.mxu3 }
 0xc2a   : > { %2160 = vmatmul.msk.f32.gmra.mxu0 %vm607_vm1, %v1474_v7  ;;  %vm1779_vm1 = vcmask 41984  }
 0xc32   : > { %2182 = vmatmul.msk.f32.vlgmr.msrb.gmra.mxu0 %vm521_vm0, %v1752_v9 }
 0xc9f   : > { %v1503_v11 = vpop.f32.mrf.mxu0 }
 0xca0   : > { %v1533_v12 = vadd.f32 %v1532_v10, %v1503_v11 }
 0xca2   : > { %v1538_v13 = vadd.f32 %v1533_v12, %v2801_v60  ;;  %v2170_v12 = vld [vmem:[%s3070_s8 + $0x58] sm:$0xff] }
 0xca3   : > { %1662 = vmatpush.msra.mxu3 %v2170_v12 }
 0xca4   : > { %v1540_v14 = vsel %vm521_vm0, %v1538_v13, 0.0 }
 0xca5   : > { %1541 = vadd.xlane.f32.xlu0 %v1540_v14  ;;  %v2168_v14 = vld [vmem:[%s3070_s8 + $0x48] sm:$0xff] }
 0xca7   : > { %v1506_v17 = vpop.f32.mrf.mxu0 }
 0xca8   : > { %v1536_v18 = vadd.f32 %v1535_v15, %v1506_v17 }
 0xcaa   : > { %v1539_v20 = vadd.f32 %v1536_v18, %v2810_v1 }
 0xcac   : > { %v1543_v21 = vsel %vm521_vm0, %v1539_v20, 0.0 }
 0xcad   : > { %1544 = vadd.xlane.f32.xlu1 %v1543_v21 }
 0xcaf   : > { %v1776_v22 = vpop.f32.mrf.mxu0 }
 0xcb0   : > { %v1780_v23 = vsel %vm1779_vm1, %v1776_v22, -inf }
 0xcb5   : > { %1781 = vmax.xlane.f32.xlu1 %v1780_v23 }
 0xd18   : > { %v1542_v24 = vpop.xlane.xlu0 %1541 }
 0xd19   : > { %v1546_v25 = vmul.f32 %v1542_v24, %v2658_v16 }
 0xd1b   : > { %v1548_v60 = vsub.f32 %v1538_v13, %v1546_v25  ;;  %v2169_v13 = vld [vmem:[%s3070_s8 + $0x50] sm:$0xff] }
 0xd1c   : > { %1663 = vmatpush.msra.mxu3 %v2169_v13 }
 0xd1d   : > { %v1550_v26 = vmul.f32 %v1548_v60, %v1548_v60 }
 0xd1e   : > { %1664 = vmatpush.msra.mxu3 %v2168_v14 }
 0xd1f   : > { %v1552_v27 = vsel %vm521_vm0, %v1550_v26, 0.0 }
 0xd20   : > { %1553 = vadd.xlane.f32.xlu2 %v1552_v27  ;;  %v1545_v28 = vpop.xlane.xlu1 %1544 }
 0xd21   : > { %v1547_v29 = vmul.f32 %v1545_v28, %v2658_v16 }
 0xd23   : > { %v2902_v1 = vsub.f32 %v1539_v20, %v1547_v29 }
 0xd25   : > { %v1551_v30 = vmul.f32 %v2902_v1, %v2902_v1 }
 0xd27   : > { %v1555_v31 = vsel %vm521_vm0, %v1551_v30, 0.0 }
 0xd28   : > { %1556 = vadd.xlane.f32.xlu0 %v1555_v31  ;;  %v1782_v40 = vpop.xlane.xlu1 %1781 }
 0xd29   : > { %v1783_v44 = vsub.f32 %v1776_v22, %v1782_v40 }
 0xd2b   : > { %v1784_v47 = vmul.f32 1.442695, %v1783_v44 }
 0xd93   : > { %v1554_v36 = vpop.xlane.xlu2 %1553 }
 0xd94   : > { %v1558_v38 = vmul.f32 %v1554_v36, %v2658_v16  ;;  %v1835_v36 = vld [vmem:[%s3071_s9 + $0x20] sm:$0xff] }
 0xd95   : > { %1863 = vmatpush.msrb.mxu2 %v1835_v36 }
 0xd96   : > { %v1560_v39 = vadd.f32 1e-05, %v1558_v38 }
 0xd98   : > { %2296 = vrsqrt.f32 %v1560_v39  ;;  %vm1568_vm7 = vweird.f32 %v1560_v39 }
 0xd99   : > { %2298 = vpow2.f32 %v1784_v47 }
 0xd9b   : > { %v1557_v46 = vpop.xlane.xlu0 %1556 }
 0xd9c   : > { %v1559_v48 = vmul.f32 %v1557_v46, %v2658_v16 }
 0xd9e   : > { %v2297_v50 = vpop.eup %2296  ;;  %v1561_v51 = vadd.f32 1e-05, %v1559_v48 }
 0xd9f   : > { %v1563_v53 = vmul.f32 %v2297_v50, %v1560_v39  ;;  %v2299_v55 = vpop.eup %2298  ;;  %vm1569_vm6 = vweird.f32 %v2297_v50  ;;  %v2245_v39 = vld [vmem:[%s3070_s8 + $0x88] ss:$0 sm:$0xff] }
 0xda0   : > { %2300 = vrsqrt.f32 %v1561_v51  ;;  %v1786_v57 = vsel %vm1779_vm1, %v2299_v55, 0.0  ;;  %vm1570_vm8 = vmor %vm1568_vm7, %vm1569_vm6  ;;  %vm1578_vm10 = vweird.f32 %v1561_v51 }
 0xda1   : > { %v1564_v54 = vmul.f32 %v2297_v50, %v1563_v53  ;;  %1787 = vadd.xlane.f32.xlu2 %v1786_v57 }
 0xda3   : > { %v1565_v56 = vmul.f32 0.5, %v1564_v54 }
 0xda5   : > { %v1566_v58 = vsub.f32 1.5, %v1565_v56 }
 0xda6   : > { %v2301_v59 = vpop.eup %2300 }
 0xda7   : > { %v1567_v61 = vmul.f32 %v2297_v50, %v1566_v58  ;;  %v1573_v37 = vmul.f32 %v2301_v59, %v1561_v51  ;;  %vm1579_vm9 = vweird.f32 %v2301_v59 }
 0xda8   : > { %vm1580_vm11 = vmor %vm1578_vm10, %vm1579_vm9  ;;  %vm1870_vm10 = vcmask 1041409  }
 0xda9   : > { %v1571_v42 = vsel %vm1570_vm8, %v2297_v50, %v1567_v61  ;;  %v1574_v63 = vmul.f32 %v2301_v59, %v1573_v37 }
 0xdaa   : > { %v1582_v0 = vmul.f32 %v1571_v42, %v1548_v60  ;;  %v2244_v60 = vld [vmem:[%s3069_s7 + $0x48] ss:$0 sm:$0xff]  ;;  %v1833_v42 = vld [vmem:[%s3071_s9 + $0x10] sm:$0xff] }
 0xdab   : > { %v1575_v3 = vmul.f32 0.5, %v1574_v63 }
 0xdac   : > { %v1587_v19 = vmul.f32 %v2242_v62, %v1582_v0  ;;  %v1832_v0 = vld [vmem:[%s3071_s9 + $0x8] sm:$0xff] }
 0xdad   : > { %v1576_v4 = vsub.f32 1.5, %v1575_v3  ;;  %v1831_v3 = vld [vmem:[%s3071_s9] sm:$0xff] }
 0xdae   : > { %v1592_v5 = vadd.f32 %v2243_v2, %v1587_v19 }
 0xdaf   : > { %v1577_v6 = vmul.f32 %v2301_v59, %v1576_v4 }
 0xdb0   : > { %2177 = vmatmul.msk.f32.vlgmr.msra.gmra.mxu2 %vm521_vm0, %v1592_v5 }
 0xdb1   : > { %v1581_v7 = vsel %vm1580_vm11, %v2301_v59, %v1577_v6  ;;  %vm1921_vm11 = vcmask 74752  }
 0xdb2   : > { %v1583_v9 = vmul.f32 %v1581_v7, %v2902_v1 }
 0xdb4   : > { %v1588_v10 = vmul.f32 %v2242_v62, %v1583_v9  ;;  %v1834_v62 = vld [vmem:[%s3071_s9 + $0x18] sm:$0xff] }
 0xdb5   : > { %1886 = vmatpush.msrb.mxu3 %v1834_v62 }
 0xdb6   : > { %v1593_v11 = vadd.f32 %v2243_v2, %v1588_v10 }
 0xdb7   : > { %1887 = vmatpush.msrb.mxu3 %v1833_v42 }
 0xdb8   : > { %2178 = vmatmul.msk.f32.gmra.mxu2 %vm521_vm0, %v1593_v11 }
 0xdb9   : > { %1888 = vmatpush.msrb.mxu3 %v1832_v0 }
 0xdbb   : > { %1889 = vmatpush.msrb.mxu3 %v1831_v3 }
 0xe14   : > { %v1788_v15 = vpop.xlane.xlu2 %1787 }
 0xe15   : > { %2302 = vrcp.f32 %v1788_v15  ;;  %v1800_v20 = vand.u32 2147483648, %v1788_v15  ;;  %vm1794_vm14 = vweird.f32 %v1788_v15  ;;  %v1798_v22 = vand.u32 2147483647, %v1788_v15 }
 0xe17   : > { %v1801_v24 = vor.u32 1.1754944e-38, %v1800_v20  ;;  %vm1799_vm3 = vcmp.eq.f32.partialorder %v1798_v22, 8.507059e+37 }
 0xe1b   : > { %v2303_v17 = vpop.eup %2302 }
 0xe1c   : > { %v1790_v18 = vmul.f32 %v2303_v17, %v1788_v15  ;;  %vm1795_vm15 = vweird.f32 %v2303_v17  ;;  %v2380_v15 = vmov 8.0  }
 0xe1d   : > { %vm1796_vm2 = vmor %vm1794_vm14, %vm1795_vm15 }
 0xe1e   : > { %v1791_v21 = vsub.f32 1.0, %v1790_v18 }
 0xe20   : > { %v1792_v23 = vmul.f32 %v2303_v17, %v1791_v21 }
 0xe22   : > { %v1793_v25 = vadd.f32 %v2303_v17, %v1792_v23 }
 0xe24   : > { %v1797_v26 = vsel %vm1796_vm2, %v2303_v17, %v1793_v25  ;;  %v2247_v17 = vld [vmem:[%s3068_s6 + $0x7] ss:$0 sm:$0xff] }
 0xe25   : > { %v1802_v27 = vsel %vm1799_vm3, %v1801_v24, %v1797_v26 }
 0xe26   : > { %v1803_v8 = vmul.f32 %v2299_v55, %v1802_v27 }
 0xe28   : > { %2184 = vmatmul.msk.f32.vlgmr.msrb.gmra.mxu1 %vm1804_vm4, %v1803_v8 }
 0xe33   : > { %v1634_v28 = vpop.f32.mrf.mxu2 }
 0xe34   : > { %v1635_v29 = vadd.f32 %v2244_v60, %v1634_v28 }
 0xe36   : > { %v1640_v1 = vmax.f32 %v1635_v29, 0.0 }
 0xe38   : > { %2179 = vmatmul.msk.f32.vlgmr.msra.gmra.mxu3 %vm1037_vm13, %v1640_v1 }
 0xe3b   : > { %v1637_v30 = vpop.f32.mrf.mxu2 }
 0xe3c   : > { %v1638_v31 = vadd.f32 %v2244_v60, %v1637_v30 }
 0xe3e   : > { %v1641_v32 = vmax.f32 %v1638_v31, 0.0 }
 0xe40   : > { %2180 = vmatmul.msk.f32.gmra.mxu3 %vm1037_vm13, %v1641_v32 }
 0xea5   : > { %v1828_v38 = vpop.f32.mrf.mxu1 }
 0xea6   : > { %2185 = vmatmul.msk.f32.vlgmr.msrb.gmra.mxu2 %vm521_vm0, %v1828_v38 }
 0xebb   : > { %v1666_v40 = vpop.f32.mrf.mxu3 }
 0xebc   : > { %v1667_v41 = vadd.f32 %v2245_v39, %v1666_v40 }
 0xebe   : > { %v1672_v43 = vadd.f32 %v1667_v41, %v1592_v5 }
 0xec0   : > { %v1674_v44 = vsel %vm521_vm0, %v1672_v43, 0.0 }
 0xec1   : > { %1675 = vadd.xlane.f32.xlu0 %v1674_v44 }
 0xec3   : > { %v1669_v45 = vpop.f32.mrf.mxu3 }
 0xec4   : > { %v1670_v46 = vadd.f32 %v2245_v39, %v1669_v45 }
 0xec6   : > { %v1673_v47 = vadd.f32 %v1670_v46, %v1593_v11 }
 0xec8   : > { %v1677_v48 = vsel %vm521_vm0, %v1673_v47, 0.0 }
 0xec9   : > { %1678 = vadd.xlane.f32.xlu1 %v1677_v48 }
 0xf34   : > { %v1676_v49 = vpop.xlane.xlu0 %1675 }
 0xf35   : > { %v1680_v50 = vmul.f32 %v1676_v49, %v2658_v16 }
 0xf37   : > { %v1682_v51 = vsub.f32 %v1672_v43, %v1680_v50 }
 0xf39   : > { %v1684_v52 = vmul.f32 %v1682_v51, %v1682_v51 }
 0xf3b   : > { %v1686_v53 = vsel %vm521_vm0, %v1684_v52, 0.0  ;;  %v1842_v52 = vld [vmem:[%s3072_s10 + $0x10] sm:$0xff] }
 0xf3c   : > { %v1679_v54 = vpop.xlane.xlu1 %1678  ;;  %1687 = vadd.xlane.f32.xlu2 %v1686_v53  ;;  %v1841_v53 = vld [vmem:[%s3072_s10 + $0x8] sm:$0xff] }
 0xf3d   : > { %v1681_v55 = vmul.f32 %v1679_v54, %v2658_v16  ;;  %v1840_v54 = vld [vmem:[%s3072_s10] sm:$0xff] }
 0xf3f   : > { %v1683_v56 = vsub.f32 %v1673_v47, %v1681_v55  ;;  %v2248_v55 = vld [vmem:[%s3071_s9 + $0x40] ss:$0 sm:$0xff] }
 0xf41   : > { %v1685_v57 = vmul.f32 %v1683_v56, %v1683_v56 }
 0xf43   : > { %v1689_v58 = vsel %vm521_vm0, %v1685_v57, 0.0 }
 0xf44   : > { %1690 = vadd.xlane.f32.xlu0 %v1689_v58 }
 0xfaf   : > { %v1688_v59 = vpop.xlane.xlu2 %1687 }
 0xfb0   : > { %v1692_v61 = vmul.f32 %v1688_v59, %v2658_v16 }
 0xfb2   : > { %v1694_v37 = vadd.f32 1e-05, %v1692_v61 }
 0xfb4   : > { %2304 = vrsqrt.f32 %v1694_v37  ;;  %vm1702_vm5 = vweird.f32 %v1694_v37 }
 0xfb7   : > { %v1691_v63 = vpop.xlane.xlu0 %1690 }
 0xfb8   : > { %v1693_v2 = vmul.f32 %v1691_v63, %v2658_v16  ;;  %v2246_v16 = vld [vmem:[%s3068_s6 + $0x6] ss:$0 sm:$0xff] }
 0xfba   : > { %v2305_v19 = vpop.eup %2304  ;;  %v1695_v4 = vadd.f32 1e-05, %v1693_v2 }
 0xfbb   : > { %v1697_v5 = vmul.f32 %v2305_v19, %v1694_v37  ;;  %vm1703_vm13 = vweird.f32 %v2305_v19  ;;  %v2249_v37 = vld [vmem:[%s3072_s10 + $0x20] ss:$0 sm:$0xff] }
 0xfbc   : > { %2306 = vrsqrt.f32 %v1695_v4  ;;  %vm1704_vm1 = vmor %vm1702_vm5, %vm1703_vm13  ;;  %vm1712_vm7 = vweird.f32 %v1695_v4 }
 0xfbd   : > { %v1698_v6 = vmul.f32 %v2305_v19, %v1697_v5  ;;  %2308 = vrcp.f32 %v2380_v15 }
 0xfbf   : > { %v1699_v7 = vmul.f32 0.5, %v1698_v6 }
 0xfc1   : > { %v1700_v9 = vsub.f32 1.5, %v1699_v7 }
 0xfc2   : > { %v2307_v10 = vpop.eup %2306 }
 0xfc3   : > { %v1701_v11 = vmul.f32 %v2305_v19, %v1700_v9  ;;  %v1707_v12 = vmul.f32 %v2307_v10, %v1695_v4  ;;  %vm1713_vm6 = vweird.f32 %v2307_v10  ;;  %v2309_v24 = vpop.eup %2308 }
 0xfc4   : > { %vm1714_vm8 = vmor %vm1712_vm7, %vm1713_vm6  ;;  %v1743_v28 = vmul.f32 8.0, %v2309_v24  ;;  %vm1747_vm9 = vweird.f32 %v2309_v24 }
 0xfc5   : > { %v1705_v13 = vsel %vm1704_vm1, %v2305_v19, %v1701_v11  ;;  %v1708_v14 = vmul.f32 %v2307_v10, %v1707_v12 }
 0xfc6   : > { %v1716_v18 = vmul.f32 %v1705_v13, %v1682_v51  ;;  %v1744_v32 = vsub.f32 1.0, %v1743_v28  ;;  %v1843_v51 = vld [vmem:[%s3072_s10 + $0x18] sm:$0xff] }
 0xfc7   : > { %v1709_v20 = vmul.f32 0.5, %v1708_v14  ;;  %1913 = vmatpush.msra.mxu0 %v1843_v51 }
 0xfc8   : > { %v1721_v21 = vmul.f32 %v2246_v16, %v1716_v18  ;;  %v1745_v36 = vmul.f32 %v2309_v24, %v1744_v32 }
 0xfc9   : > { %v1710_v22 = vsub.f32 1.5, %v1709_v20  ;;  %1914 = vmatpush.msra.mxu0 %v1842_v52 }
 0xfca   : > { %v1726_v23 = vadd.f32 %v2247_v17, %v1721_v21  ;;  %v1746_v41 = vadd.f32 %v2309_v24, %v1745_v36 }
 0xfcb   : > { %v1711_v25 = vmul.f32 %v2307_v10, %v1710_v22  ;;  %1915 = vmatpush.msra.mxu0 %v1841_v53 }
 0xfcc   : > { %v1728_v60 = vsel %vm521_vm0, %v1726_v23, 0.0  ;;  %v1748_v46 = vsel %vm1747_vm9, %v2309_v24, %v1746_v41 }
 0xfcd   : > { %v1729_v26 = vrot.slane %v1728_v60, 4  ;;  %v1715_v27 = vsel %vm1714_vm8, %v2307_v10, %v1711_v25  ;;  %1916 = vmatpush.msra.mxu0 %v1840_v54 }
 0xfce   : > { %v1717_v8 = vmul.f32 %v1715_v27, %v1683_v56  ;;  %v1865_v56 = vpop.f32.mrf.mxu2 }
 0xfcf   : > { %v1730_v29 = vadd.f32 %v1729_v26, %v1728_v60 }
 0xfd0   : > { %v1722_v1 = vmul.f32 %v2246_v16, %v1717_v8 }
 0xfd1   : > { %v1731_v30 = vrot.slane %v1730_v29, 2 }
 0xfd2   : > { %v1727_v31 = vadd.f32 %v2247_v17, %v1722_v1 }
 0xfd3   : > { %v1732_v35 = vadd.f32 %v1731_v30, %v1730_v29 }
 0xfd4   : > { %v1735_v33 = vsel %vm521_vm0, %v1727_v31, 0.0 }
 0xfd5   : > { %v1736_v34 = vrot.slane %v1735_v33, 4  ;;  %v1733_v39 = vrot.slane %v1732_v35, 1 }
 0xfd7   : > { %v1737_v38 = vadd.f32 %v1736_v34, %v1735_v33  ;;  %v1734_v44 = vadd.f32 %v1733_v39, %v1732_v35 }
 0xfd9   : > { %v1738_v40 = vrot.slane %v1737_v38, 2  ;;  %v1749_v48 = vmul.f32 %v1748_v46, %v1734_v44 }
 0xfdb   : > { %v1739_v43 = vadd.f32 %v1738_v40, %v1737_v38 }
 0xfdd   : > { %v1740_v45 = vrot.slane %v1739_v43, 1 }
 0xfdf   : > { %v1741_v47 = vadd.f32 %v1740_v45, %v1739_v43 }
 0xfe1   : > { %v1750_v49 = vmul.f32 %v1748_v46, %v1741_v47 }
 0xfe3   : > { %v1871_v50 = vsel %vm1870_vm10, %v1750_v49, %v1749_v48 }
 0xfe4   : > { %2186 = vmatmul.msk.f32.vlgmr.msrb.gmra.mxu3 %vm521_vm0, %v1871_v50 }
0x1067   : > { %v1891_v57 = vpop.f32.mrf.mxu3 }
0x1068   : > { %v1892_v58 = vadd.f32 %v1891_v57, %v1865_v56 }
0x106a   : > { %v1895_v59 = vadd.f32 %v2248_v55, %v1892_v58 }
0x106c   : > { %v1896_v61 = vmax.f32 %v1895_v59, 0.0 }
0x106e   : > { %2187 = vmatmul.msk.f32.vlgmr.msra.gmra.mxu0 %vm521_vm0, %v1896_v61 }
0x10eb   : > { %v1918_v62 = vpop.f32.mrf.mxu0 }
0x10ec   : > { %v1919_v42 = vadd.f32 %v2249_v37, %v1918_v62 }
0x10ee   : > { %v1922_v63 = vsel %vm1921_vm11, %v1919_v42, -inf }
0x10ef   : > { %1923 = vmax.xlane.f32.xlu1 %v1922_v63 }
0x1162   : > { %v1924_v0 = vpop.xlane.xlu1 %1923 }
0x1163   : > { %v1925_v2 = vsub.f32 %v1919_v42, %v1924_v0 }
0x1165   : > { %v1926_v3 = vmul.f32 1.442695, %v1925_v2 }
0x1167   : > { %2310 = vpow2.f32 %v1926_v3 }
0x116d   : > { %v2311_v19 = vpop.eup %2310 }
0x116e   : > { %v1928_v4 = vsel %vm1921_vm11, %v2311_v19, 0.0 }
0x116f   : > { %1929 = vadd.xlane.f32.xlu2 %v1928_v4 }
0x11e2   : > { %v1930_v5 = vpop.xlane.xlu2 %1929 }
0x11e3   : > { %2312 = vlog2.f32 %v1930_v5 }
0x11e9   : > { %v2313_v6 = vpop.eup %2312 }
0x11ea   : > { %v1932_v7 = vmul.f32 0.6931472, %v2313_v6 }
0x11ec   : > { %v1933_v9 = vsub.f32 %v1925_v2, %v1932_v7 }
0x11ee   : > { %1934 = vst.msk [vmem:[%s456_s25] sm:$0x3] %vm1921_vm11, %v1933_v9 }
0x11ef   : > { %2341 = shalt.err (!%p2338_p7)
}
0x11f0   : > { %2193 = dma.vmem_to_hbm [thread:$0]  (%p2480_p6), %s1949_s29, 32, %s1951_s12, %s1936_s0  }
0x11f1 PF: > { %s1962_s30 = sand.u32 1, %s2364_s17   ;;  %p2196_p10 = pnand %p2039_p9, %p2484_p8 }
0x11f2   : > { %s1963_s22 = scalar_lea.sflag [#allocation4], %s1962_s30 }
0x11f3   : > { %p2197_p11 = pneg %p2196_p10 }
0x11f5   : > { %2359 = dma.done.wait (%p2197_p11), %s1963_s22, 32  }
0x11f6   : > { %2361 = vsyncadd (%p2197_p11), %s1963_s22, 4294967264  ;;  %s3081_s24 = sld [smem:[#allocation6_spill]]  ;;  %p21_p12 = scmp.ge.s32.totalorder %s2466_s23, 4  }
0x11f7   : > { %s3082_s19 = sld [smem:[#allocation7_spill]]  ;;  %s3083_s17 = smov %s2368_s18 }
0x11f8   : > { %s3085_s20 = smov %s2466_s23  ;;  %23 = sbr.rel (!%p21_p12) target bundleno = 5 (0x5), region = 166 }
0x11fc   : > { %s3084_s18 = smov %s3081_s24 }
0x11fd   :  { %1969 = vsyncpa [#allocation4], 1 }
0x11fe   :  { %1971 = vsyncpa [#allocation4 + $0x1], 1 }

</bundles_post_ra>
